<compile_context>
chip_gen: v7x
topology: tpu7x:2x2x1
jax: 0.10.0
libtpu: 0.0.40
codegen_flags: <defaults>
</compile_context>

<pallas_src>
import functools

import jax
import jax.numpy as jnp
from jax.experimental import pallas as pl
from jax.experimental.pallas import tpu as pltpu

# MXU input dtype for all matmuls (accumulation is always f32).
# Set to jnp.float32 for exact parity with the PyTorch f32 reference (slower on the MXU).
MXU_DTYPE = jnp.bfloat16


# -----------------------------------------------------------------------------
# Fused encoder-layer kernel (one batch tile of Bt examples per grid step)
# -----------------------------------------------------------------------------
def _encoder_layer_kernel(*refs, H, dk, dv, Bt, L, has_mask, return_attn):
    i = 0
    x_ref = refs[i]; i += 1
    bias_ref = None
    if has_mask:
        bias_ref = refs[i]; i += 1
    (wqkv_ref, bqkv_ref, wfc_ref, bfc_ref, ln1g_ref, ln1b_ref,
     w1_ref, b1_ref, w2_ref, b2_ref, ln2g_ref, ln2b_ref) = refs[i:i + 12]
    i += 12
    out_ref = refs[i]; i += 1
    attn_ref = None
    if return_attn:
        attn_ref = refs[i]; i += 1
    heads_ref = refs[i]                                         # VMEM scratch (Bt*L, H*dv)

    R = Bt * L
    x = x_ref[...]                                              # (R, D) f32

    # ---- packed QKV projection: one MXU matmul (M = Bt*L rows) for all heads --------
    qkv = jnp.dot(x.astype(wqkv_ref.dtype), wqkv_ref[...],
                  preferred_element_type=jnp.float32) + bqkv_ref[...]   # (R, H*(2dk+dv))
    q_all = qkv[:, :H * dk]                 # already pre-scaled by 1/temperature
    k_all = qkv[:, H * dk:2 * H * dk]
    v_all = qkv[:, 2 * H * dk:]

    if has_mask:
        bias = bias_ref[...]                                    # (Bt, L, L) additive, f32

    # ---- per-head scaled-dot-product attention (static unroll over heads) -----------
    # TODO(synk): batch the score / P.V matmuls over >=2 heads per dot_general (needs a
    # head-major relayout of q/k/v) to better fill the MXU contraction when dk is small.
    # TODO(synk): for large L add a KV-tile grid axis with online softmax; this design
    # keeps each head's full (Bt, L, L) score tile resident in VMEM.
    for h in range(H):
        q3 = q_all[:, h * dk:(h + 1) * dk].reshape(Bt, L, dk).astype(MXU_DTYPE)
        k3 = k_all[:, h * dk:(h + 1) * dk].reshape(Bt, L, dk).astype(MXU_DTYPE)
        v3 = v_all[:, h * dv:(h + 1) * dv].reshape(Bt, L, dv).astype(MXU_DTYPE)
        # (Bt, L, L) f32 scores; dot_general avoids materializing an explicit K^T.
        s = jax.lax.dot_general(q3, k3, (((2,), (2,)), ((0,), (0,))),
                                preferred_element_type=jnp.float32)
        if has_mask:
            s = s + bias
        s_max = jnp.max(s, axis=-1, keepdims=True)
        p = jnp.exp(s - s_max)
        denom = jnp.sum(p, axis=-1, keepdims=True)
        attn = p * pl.reciprocal(denom, approx=False)           # exact: rows sum to 1
        # dropout on attn: identity (eval mode)
        if return_attn:
            attn_ref[h] = attn.astype(attn_ref.dtype)
        o = jax.lax.dot_general(attn.astype(MXU_DTYPE), v3,
                                (((2,), (1,)), ((0,), (0,))),
                                preferred_element_type=jnp.float32)     # (Bt, L, dv)
        heads_ref[:, h * dv:(h + 1) * dv] = o.reshape(R, dv)    # lane-slice write, no concat

    # ---- output projection + residual + LayerNorm 1 ---------------------------------
    y = jnp.dot(heads_ref[...].astype(wfc_ref.dtype), wfc_ref[...],
                preferred_element_type=jnp.float32) + bfc_ref[...]
    # dropout: identity (eval mode)
    z = y + x
    mu = jnp.mean(z, axis=-1, keepdims=True)
    var = jnp.mean((z - mu) ** 2, axis=-1, keepdims=True)
    h1 = (z - mu) * jax.lax.rsqrt(var + 1e-5) * ln1g_ref[...] + ln1b_ref[...]

    # ---- position-wise FFN (two 1x1 convs == matmuls) + residual + LayerNorm 2 ------
    f = jnp.dot(h1.astype(w1_ref.dtype), w1_ref[...],
                preferred_element_type=jnp.float32) + b1_ref[...]
    f = jnp.maximum(f, 0.0)                                     # ReLU
    y2 = jnp.dot(f.astype(w2_ref.dtype), w2_ref[...],
                 preferred_element_type=jnp.float32) + b2_ref[...]
    # dropout: identity (eval mode)
    z2 = y2 + h1
    mu2 = jnp.mean(z2, axis=-1, keepdims=True)
    var2 = jnp.mean((z2 - mu2) ** 2, axis=-1, keepdims=True)
    out_ref[...] = (z2 - mu2) * jax.lax.rsqrt(var2 + 1e-5) * ln2g_ref[...] + ln2b_ref[...]


# -----------------------------------------------------------------------------
# VMEM budgeting and batch-tile selection
# -----------------------------------------------------------------------------
def _vmem_bytes_estimate(Bt, L, D, Hq, H, dv, Dh, attn_bytes, has_mask, return_attn):
    R = Bt * L
    Hdv = H * dv
    weights = 2 * (D * Hq + Hdv * D + D * Dh + Dh * D) + 4 * (Hq + 6 * D + Dh)
    weights *= 2                                      # pipeline double-buffering
    blocks = 2 * (R * D * 4) * 2                      # x + out blocks, double-buffered
    if return_attn:
        blocks += 2 * H * Bt * L * L * attn_bytes
    if has_mask:
        blocks += 2 * Bt * L * L * 4
    scratch = R * Hdv * 4
    live = R * (Hq + Hdv + 4 * D + Dh) * 4 + 3 * Bt * L * L * 4   # rough intermediates
    return weights + blocks + scratch + live


def _rows_ok(bt, B, L):
    # BlockSpec rule: second-to-last block dim must be a multiple of 8 or the full dim.
    return bt == B or (bt * L) % 8 == 0


def _choose_block_b(B, L, D, Hq, H, dv, Dh, attn_bytes, has_mask, return_attn):
    divisors = [d for d in range(1, B + 1) if B % d == 0]
    budget = 48 << 20                                  # conservative vs v7x's 64 MiB VMEM
    best = B
    for d in sorted(divisors, reverse=True):
        if (d * L <= 1024 and _rows_ok(d, B, L) and
                _vmem_bytes_estimate(d, L, D, Hq, H, dv, Dh, attn_bytes,
                                     has_mask, return_attn) <= budget):
            best = d
            break
    # Prefer >=2 grid steps so v7x's two TensorCores both get work (no-op on v5e/v6e).
    if B // best == 1 and B % 2 == 0:
        cands = [d for d in divisors if d <= B // 2 and _rows_ok(d, B, L)]
        if cands:
            best = max(cands)
    return best


# -----------------------------------------------------------------------------
# pallas_call wrapper
# -----------------------------------------------------------------------------
def encoder_layer_fused(x, packed, H, dk, dv, *, mask_bias=None, return_attn=True,
                        attn_dtype=jnp.float32, block_b=None):
    """x: (B, L, D) f32. mask_bias: optional (B, L, L) additive f32 (-inf at masked)."""
    B, L, D = x.shape
    Hq = packed["wqkv"].shape[-1]
    Dh = packed["w1"].shape[-1]
    Hdv = H * dv
    has_mask = mask_bias is not None
    attn_bytes = jnp.dtype(attn_dtype).itemsize

    Bt = block_b if block_b is not None else _choose_block_b(
        B, L, D, Hq, H, dv, Dh, attn_bytes, has_mask, return_attn)
    assert B % Bt == 0
    steps = B // Bt
    R = Bt * L

    kernel = functools.partial(_encoder_layer_kernel, H=H, dk=dk, dv=dv, Bt=Bt, L=L,
                               has_mask=has_mask, return_attn=return_attn)

    x2 = x.reshape(B * L, D)                           # slab layout: no singleton block dims

    in_specs = [pl.BlockSpec((R, D), lambda b: (b, 0))]
    operands = [x2]
    if has_mask:
        in_specs.append(pl.BlockSpec((Bt, L, L), lambda b: (b, 0, 0)))
        operands.append(mask_bias)
    weight_keys = ["wqkv", "bqkv", "w_fc", "b_fc", "ln1_g", "ln1_b",
                   "w1", "b1", "w2", "b2", "ln2_g", "ln2_b"]
    for kname in weight_keys:
        w = packed[kname]
        in_specs.append(pl.BlockSpec(w.shape, lambda b, _nd=w.ndim: (0,) * _nd))
        operands.append(w)

    # TODO(synk): when D % 128 != 0 a lane-dense (Bt, L*D) output slab would avoid masked
    # partial stores, but the in-kernel relayout costs XLU; left as-is.
    out_shapes = [jax.ShapeDtypeStruct((B * L, D), jnp.float32)]
    out_specs = [pl.BlockSpec((R, D), lambda b: (b, 0))]
    if return_attn:
        out_shapes.append(jax.ShapeDtypeStruct((H, B, L, L), attn_dtype))
        out_specs.append(pl.BlockSpec((H, Bt, L, L), lambda b: (0, b, 0, 0)))

    est = _vmem_bytes_estimate(Bt, L, D, Hq, H, dv, Dh, attn_bytes, has_mask, return_attn)
    vmem_limit = int(min(max(int(est * 1.5) + (4 << 20), 32 << 20), 96 << 20))

    results = pl.pallas_call(
        kernel,
        out_shape=tuple(out_shapes),
        grid_spec=pltpu.PrefetchScalarGridSpec(
            num_scalar_prefetch=0,
            grid=(steps,),
            in_specs=in_specs,
            out_specs=tuple(out_specs),
            scratch_shapes=[pltpu.VMEM((R, Hdv), jnp.float32)],
        ),
        compiler_params=pltpu.CompilerParams(
            dimension_semantics=("parallel",),
            vmem_limit_bytes=vmem_limit,
        ),
    )(*operands)

    if return_attn:
        out2, attn = results
    else:
        out2 = results[0] if isinstance(results, (tuple, list)) else results
        attn = None
    return out2.reshape(B, L, D), attn


# -----------------------------------------------------------------------------
# Parameter packing (one-time): fold 1/temperature into Wq/bq, concat heads,
# cast weight matrices to the MXU dtype.
# -----------------------------------------------------------------------------
def pack_params(params):
    H, D, dk = params["wq"].shape
    dv = params["wv"].shape[-1]
    temperature = float(dk) ** 0.5

    def flat_w(w):                      # (H, D, n) -> (D, H*n), head-major columns
        return jnp.transpose(w, (1, 0, 2)).reshape(D, -1)

    def flat_b(b):                      # (H, 1, n) -> (1, H*n)
        return b.reshape(1, -1)

    wqkv = jnp.concatenate(
        [flat_w(params["wq"] / temperature), flat_w(params["wk"]), flat_w(params["wv"])],
        axis=1)
    bqkv = jnp.concatenate(
        [flat_b(params["bq"] / temperature), flat_b(params["bk"]), flat_b(params["bv"])],
        axis=1)

    packed = {
        "wqkv": wqkv.astype(MXU_DTYPE),
        "bqkv": bqkv.astype(jnp.float32),
        "w_fc": params["w_fc"].astype(MXU_DTYPE),
        "b_fc": params["b_fc"],
        "ln1_g": params["ln1_g"], "ln1_b": params["ln1_b"],
        "w1": params["w1"].astype(MXU_DTYPE), "b1": params["b1"],
        "w2": params["w2"].astype(MXU_DTYPE), "b2": params["b2"],
        "ln2_g": params["ln2_g"], "ln2_b": params["ln2_b"],
    }
    meta = dict(H=H, dk=dk, dv=dv)
    return packed, meta


# -----------------------------------------------------------------------------
# EncoderLayer forward (matches the PyTorch module signature / return values)
# -----------------------------------------------------------------------------
def encoder_layer_forward(packed, meta, enc_input, non_pad_mask=None, slf_attn_mask=None,
                          *, return_attn=True, attn_dtype=jnp.float32, block_b=None):
    # non_pad_mask is accepted but unused, matching the PyTorch EncoderLayer.forward.
    del non_pad_mask
    B, L, _ = enc_input.shape
    H, dk, dv = meta["H"], meta["dk"], meta["dv"]

    mask_bias = None
    if slf_attn_mask is not None:
        # TODO(synk): per-head masks (shape (n_head*B, L, L)) are not supported; a shared
        # (L, L) or (B, L, L) boolean mask covers the usual padding/causal cases.
        m = jnp.asarray(slf_attn_mask)
        if m.ndim == 2:
            m = jnp.broadcast_to(m, (B, L, L))
        mask_bias = jnp.where(m, -jnp.inf, 0.0).astype(jnp.float32)

    enc_output, attn = encoder_layer_fused(
        enc_input, packed, H, dk, dv, mask_bias=mask_bias, return_attn=return_attn,
        attn_dtype=attn_dtype, block_b=block_b)
    if return_attn:
        # PyTorch returns attn as (n_head*B, L, L), head-major -> pure reshape here.
        attn = attn.reshape(H * B, L, L)
    return enc_output, attn


# -----------------------------------------------------------------------------
# Pure-JAX f32 reference (parity check; bf16 MXU inputs cause small drift)
# -----------------------------------------------------------------------------
def _layernorm(z, g, b):
    mu = jnp.mean(z, axis=-1, keepdims=True)
    var = jnp.mean((z - mu) ** 2, axis=-1, keepdims=True)
    return (z - mu) * jax.lax.rsqrt(var + 1e-5) * g + b


def encoder_layer_reference(params, x, mask=None):
    H, D, dk = params["wq"].shape
    dv = params["wv"].shape[-1]
    B, L, _ = x.shape
    temperature = float(dk) ** 0.5
    q = jnp.einsum("bld,hdk->hblk", x, params["wq"]) + params["bq"][:, None]
    k = jnp.einsum("bld,hdk->hblk", x, params["wk"]) + params["bk"][:, None]
    v = jnp.einsum("bld,hdk->hblk", x, params["wv"]) + params["bv"][:, None]
    s = jnp.einsum("hbik,hbjk->hbij", q, k) / temperature
    if mask is not None:
        s = jnp.where(mask[None], -jnp.inf, s)
    attn = jax.nn.softmax(s, axis=-1)
    o = jnp.einsum("hbij,hbjd->hbid", attn, v)                       # (H, B, L, dv)
    heads = jnp.transpose(o, (1, 2, 0, 3)).reshape(B, L, H * dv)
    z1 = _layernorm(heads @ params["w_fc"] + params["b_fc"] + x,
                    params["ln1_g"], params["ln1_b"])
    f = jnp.maximum(z1 @ params["w1"] + params["b1"], 0.0)
    out = _layernorm(f @ params["w2"] + params["b2"] + z1,
                     params["ln2_g"], params["ln2_b"])
    return out, attn.reshape(H * B, L, L)


def init_params(key, d_model, d_inner, n_head, d_k, d_v):
    ks = jax.random.split(key, 12)
    std_qk = (2.0 / (d_model + d_k)) ** 0.5
    std_v = (2.0 / (d_model + d_v)) ** 0.5
    std_fc = (2.0 / (n_head * d_v + d_model)) ** 0.5    # xavier normal
    params = {
        "wq": jax.random.normal(ks[0], (n_head, d_model, d_k), jnp.float32) * std_qk,
        "wk": jax.random.normal(ks[1], (n_head, d_model, d_k), jnp.float32) * std_qk,
        "wv": jax.random.normal(ks[2], (n_head, d_model, d_v), jnp.float32) * std_v,
        "bq": jax.random.normal(ks[3], (n_head, 1, d_k), jnp.float32) * 0.01,
        "bk": jax.random.normal(ks[4], (n_head, 1, d_k), jnp.float32) * 0.01,
        "bv": jax.random.normal(ks[5], (n_head, 1, d_v), jnp.float32) * 0.01,
        "w_fc": jax.random.normal(ks[6], (n_head * d_v, d_model), jnp.float32) * std_fc,
        "b_fc": jax.random.normal(ks[7], (1, d_model), jnp.float32) * 0.01,
        "ln1_g": jnp.ones((1, d_model), jnp.float32),
        "ln1_b": jnp.zeros((1, d_model), jnp.float32),
        # 1x1 Conv1d weights stored directly in (in, out) matmul layout.
        "w1": jax.random.normal(ks[8], (d_model, d_inner), jnp.float32) * (1.0 / d_model) ** 0.5,
        "b1": jax.random.normal(ks[9], (1, d_inner), jnp.float32) * 0.01,
        "w2": jax.random.normal(ks[10], (d_inner, d_model), jnp.float32) * (1.0 / d_inner) ** 0.5,
        "b2": jax.random.normal(ks[11], (1, d_model), jnp.float32) * 0.01,
        "ln2_g": jnp.ones((1, d_model), jnp.float32),
        "ln2_b": jnp.zeros((1, d_model), jnp.float32),
    }
    return params


if __name__ == "__main__":
    B, L = 2, 8
    d_model, d_inner = 32, 64
    n_head, d_k, d_v = 4, 8, 8

    key = jax.random.PRNGKey(0)
    k_param, k_x = jax.random.split(key)
    params = init_params(k_param, d_model, d_inner, n_head, d_k, d_v)
    x = jax.random.normal(k_x, (B, L, d_model), jnp.float32)

    packed, meta = pack_params(params)

    # ---- unmasked run (mask=None, as in the default reference call) ----
    enc_output, enc_slf_attn = encoder_layer_forward(packed, meta, x)
    enc_output = jax.block_until_ready(enc_output)
    enc_slf_attn = jax.block_until_ready(enc_slf_attn)

    assert enc_output.shape == (B, L, d_model)
    assert enc_slf_attn.shape == (n_head * B, L, L)
    assert bool(jnp.all(jnp.isfinite(enc_output)))
    assert bool(jnp.all(jnp.isfinite(enc_slf_attn)))
    # Stored probabilities use an exact reciprocal -> each row sums to 1.
    assert float(jnp.max(jnp.abs(enc_slf_attn.sum(-1) - 1.0))) < 1e-3

    # Parity vs pure-f32 reference. bf16 MXU inputs (weights + q/k/attn/v casts) give
    # only small drift; LayerNorm keeps outputs O(1).
    ref_out, ref_attn = encoder_layer_reference(params, x)
    assert float(jnp.max(jnp.abs(enc_output - ref_out))) < 0.2
    assert float(jnp.max(jnp.abs(enc_slf_attn - ref_attn))) < 0.1

    # ---- masked run (causal slf_attn_mask, PyTorch masked_fill(-inf) semantics) ----
    causal = jnp.triu(jnp.ones((L, L), dtype=bool), k=1)
    mask = jnp.broadcast_to(causal, (B, L, L))
    enc_output_m, attn_m = encoder_layer_forward(packed, meta, x, slf_attn_mask=mask)
    enc_output_m = jax.block_until_ready(enc_output_m)
    attn_m = jax.block_until_ready(attn_m)
    ref_out_m, ref_attn_m = encoder_layer_reference(params, x, mask=mask)
    assert float(jnp.max(jnp.abs(enc_output_m - ref_out_m))) < 0.2
    assert float(jnp.max(jnp.abs(attn_m - ref_attn_m))) < 0.1
    # Masked positions carry exactly zero probability.
    assert float(jnp.max(jnp.abs(attn_m.reshape(n_head, B, L, L) * causal))) < 1e-6

    print("KERNEL_OK")
</pallas_src>

<mosaic_0001>
module attributes {stable_mosaic.version = 11 : i64} {
  func.func @_encoder_layer_kernel(%arg0: i32, %arg1: memref<8x32xf32, #tpu.memory_space<vmem>>, %arg2: memref<32x96xbf16, #tpu.memory_space<vmem>>, %arg3: memref<1x96xf32, #tpu.memory_space<vmem>>, %arg4: memref<32x32xbf16, #tpu.memory_space<vmem>>, %arg5: memref<1x32xf32, #tpu.memory_space<vmem>>, %arg6: memref<1x32xf32, #tpu.memory_space<vmem>>, %arg7: memref<1x32xf32, #tpu.memory_space<vmem>>, %arg8: memref<32x64xbf16, #tpu.memory_space<vmem>>, %arg9: memref<1x64xf32, #tpu.memory_space<vmem>>, %arg10: memref<64x32xbf16, #tpu.memory_space<vmem>>, %arg11: memref<1x32xf32, #tpu.memory_space<vmem>>, %arg12: memref<1x32xf32, #tpu.memory_space<vmem>>, %arg13: memref<1x32xf32, #tpu.memory_space<vmem>>, %arg14: memref<8x32xf32, #tpu.memory_space<vmem>>, %arg15: memref<4x1x8x8xf32, #tpu.memory_space<vmem>>, %arg16: memref<8x32xf32, #tpu.memory_space<vmem>>) attributes {dimension_semantics = [#tpu.dimension_semantics<parallel>], iteration_bounds = array<i64: 2>, scalar_prefetch = 0 : i64, scratch_operands = 1 : i64, tpu.core_type = #tpu.core_type<tc>, window_params = [{transform_indices = @transform_0, window_bounds = array<i64: 8, 32>}, {pipeline_mode = #tpu.pipeline_mode<synchronous>, transform_indices = @transform_1, window_bounds = array<i64: 32, 96>}, {pipeline_mode = #tpu.pipeline_mode<synchronous>, transform_indices = @transform_2, window_bounds = array<i64: 1, 96>}, {pipeline_mode = #tpu.pipeline_mode<synchronous>, transform_indices = @transform_3, window_bounds = array<i64: 32, 32>}, {pipeline_mode = #tpu.pipeline_mode<synchronous>, transform_indices = @transform_4, window_bounds = array<i64: 1, 32>}, {pipeline_mode = #tpu.pipeline_mode<synchronous>, transform_indices = @transform_5, window_bounds = array<i64: 1, 32>}, {pipeline_mode = #tpu.pipeline_mode<synchronous>, transform_indices = @transform_6, window_bounds = array<i64: 1, 32>}, {pipeline_mode = #tpu.pipeline_mode<synchronous>, transform_indices = @transform_7, window_bounds = array<i64: 32, 64>}, {pipeline_mode = #tpu.pipeline_mode<synchronous>, transform_indices = @transform_8, window_bounds = array<i64: 1, 64>}, {pipeline_mode = #tpu.pipeline_mode<synchronous>, transform_indices = @transform_9, window_bounds = array<i64: 64, 32>}, {pipeline_mode = #tpu.pipeline_mode<synchronous>, transform_indices = @transform_10, window_bounds = array<i64: 1, 32>}, {pipeline_mode = #tpu.pipeline_mode<synchronous>, transform_indices = @transform_11, window_bounds = array<i64: 1, 32>}, {pipeline_mode = #tpu.pipeline_mode<synchronous>, transform_indices = @transform_12, window_bounds = array<i64: 1, 32>}, {transform_indices = @transform_13, window_bounds = array<i64: 8, 32>}, {transform_indices = @transform_14, window_bounds = array<i64: 4, 1, 8, 8>}]} {
    %c0 = arith.constant 0 : index
    %c0_0 = arith.constant 0 : index
    %0 = vector.load %arg1[%c0, %c0_0] : memref<8x32xf32, #tpu.memory_space<vmem>>, vector<8x32xf32>
    %1 = arith.truncf %0 : vector<8x32xf32> to vector<8x32xbf16>
    %c0_1 = arith.constant 0 : index
    %c0_2 = arith.constant 0 : index
    %2 = vector.load %arg2[%c0_1, %c0_2] : memref<32x96xbf16, #tpu.memory_space<vmem>>, vector<32x96xbf16>
    %cst = arith.constant dense<0.000000e+00> : vector<8x96xf32>
    %3 = tpu.matmul %1, %2, %cst {dimension_numbers = #tpu.dot_dimension_numbers<[1], [0], [0], [1], [0, 0, 1, 1], [], []>} : vector<8x32xbf16>, vector<32x96xbf16>, vector<8x96xf32> -> vector<8x96xf32>
    %c0_3 = arith.constant 0 : index
    %c0_4 = arith.constant 0 : index
    %4 = vector.load %arg3[%c0_3, %c0_4] : memref<1x96xf32, #tpu.memory_space<vmem>>, vector<1x96xf32>
    %5 = vector.broadcast %4 : vector<1x96xf32> to vector<8x96xf32>
    %6 = arith.addf %3, %5 : vector<8x96xf32>
    %7 = vector.extract_strided_slice %6 {offsets = [0, 0], sizes = [8, 32], strides = [1, 1]} : vector<8x96xf32> to vector<8x32xf32>
    %8 = vector.extract_strided_slice %6 {offsets = [0, 32], sizes = [8, 32], strides = [1, 1]} : vector<8x96xf32> to vector<8x32xf32>
    %9 = vector.extract_strided_slice %6 {offsets = [0, 64], sizes = [8, 32], strides = [1, 1]} : vector<8x96xf32> to vector<8x32xf32>
    %10 = vector.extract_strided_slice %7 {offsets = [0, 0], sizes = [8, 8], strides = [1, 1]} : vector<8x32xf32> to vector<8x8xf32>
    %11 = vector.shape_cast %10 : vector<8x8xf32> to vector<1x8x8xf32>
    %12 = arith.truncf %11 : vector<1x8x8xf32> to vector<1x8x8xbf16>
    %13 = vector.extract_strided_slice %8 {offsets = [0, 0], sizes = [8, 8], strides = [1, 1]} : vector<8x32xf32> to vector<8x8xf32>
    %14 = vector.shape_cast %13 : vector<8x8xf32> to vector<1x8x8xf32>
    %15 = arith.truncf %14 : vector<1x8x8xf32> to vector<1x8x8xbf16>
    %16 = vector.extract_strided_slice %9 {offsets = [0, 0], sizes = [8, 8], strides = [1, 1]} : vector<8x32xf32> to vector<8x8xf32>
    %17 = vector.shape_cast %16 : vector<8x8xf32> to vector<1x8x8xf32>
    %18 = arith.truncf %17 : vector<1x8x8xf32> to vector<1x8x8xbf16>
    %cst_5 = arith.constant dense<0.000000e+00> : vector<1x8x8xf32>
    %19 = tpu.matmul %12, %15, %cst_5 {dimension_numbers = #tpu.dot_dimension_numbers<[2], [2], [1], [1], [0, 0, 0, 1, 1, 1], [0], [0]>} : vector<1x8x8xbf16>, vector<1x8x8xbf16>, vector<1x8x8xf32> -> vector<1x8x8xf32>
    %cst_6 = arith.constant dense<0xFF800000> : vector<1x8xf32>
    %20 = vector.multi_reduction <maximumf>, %19, %cst_6 [2] : vector<1x8x8xf32> to vector<1x8xf32>
    %21 = vector.shape_cast %20 : vector<1x8xf32> to vector<1x8x1xf32>
    %22 = vector.broadcast %21 : vector<1x8x1xf32> to vector<1x8x8xf32>
    %23 = arith.subf %19, %22 : vector<1x8x8xf32>
    %24 = math.exp %23 : vector<1x8x8xf32>
    %cst_7 = arith.constant dense<0.000000e+00> : vector<1x8xf32>
    %25 = vector.multi_reduction <add>, %24, %cst_7 [2] : vector<1x8x8xf32> to vector<1x8xf32>
    %26 = vector.shape_cast %25 : vector<1x8xf32> to vector<1x8x1xf32>
    %27 = tpu.reciprocal %26 : vector<1x8x1xf32> -> vector<1x8x1xf32>
    %28 = vector.broadcast %27 : vector<1x8x1xf32> to vector<1x8x8xf32>
    %29 = arith.mulf %24, %28 : vector<1x8x8xf32>
    %c0_8 = arith.constant 0 : index
    %c0_9 = arith.constant 0 : index
    %c0_10 = arith.constant 0 : index
    %c0_11 = arith.constant 0 : index
    %30 = vector.load %arg15[%c0_8, %c0_9, %c0_10, %c0_11] : memref<4x1x8x8xf32, #tpu.memory_space<vmem>>, vector<1x1x8x8xf32>
    %31 = vector.shape_cast %30 : vector<1x1x8x8xf32> to vector<1x8x8xf32>
    %32 = vector.shape_cast %29 : vector<1x8x8xf32> to vector<1x1x8x8xf32>
    tpu.vector_store %arg15[%c0_8, %c0_9, %c0_10, %c0_11], %32 {strides = array<i32>} : memref<4x1x8x8xf32, #tpu.memory_space<vmem>>, vector<1x1x8x8xf32>,
    %33 = arith.truncf %29 : vector<1x8x8xf32> to vector<1x8x8xbf16>
    %cst_12 = arith.constant dense<0.000000e+00> : vector<1x8x8xf32>
    %34 = tpu.matmul %33, %18, %cst_12 {dimension_numbers = #tpu.dot_dimension_numbers<[2], [1], [1], [2], [0, 0, 0, 1, 1, 2], [0], [0]>} : vector<1x8x8xbf16>, vector<1x8x8xbf16>, vector<1x8x8xf32> -> vector<1x8x8xf32>
    %35 = vector.shape_cast %34 : vector<1x8x8xf32> to vector<8x8xf32>
    %c0_13 = arith.constant 0 : index
    %c0_14 = arith.constant 0 : index
    %36 = vector.load %arg16[%c0_13, %c0_14] : memref<8x32xf32, #tpu.memory_space<vmem>>, vector<8x8xf32>
    tpu.vector_store %arg16[%c0_13, %c0_14], %35 {strides = array<i32>} : memref<8x32xf32, #tpu.memory_space<vmem>>, vector<8x8xf32>,
    %37 = vector.extract_strided_slice %7 {offsets = [0, 8], sizes = [8, 8], strides = [1, 1]} : vector<8x32xf32> to vector<8x8xf32>
    %38 = vector.shape_cast %37 : vector<8x8xf32> to vector<1x8x8xf32>
    %39 = arith.truncf %38 : vector<1x8x8xf32> to vector<1x8x8xbf16>
    %40 = vector.extract_strided_slice %8 {offsets = [0, 8], sizes = [8, 8], strides = [1, 1]} : vector<8x32xf32> to vector<8x8xf32>
    %41 = vector.shape_cast %40 : vector<8x8xf32> to vector<1x8x8xf32>
    %42 = arith.truncf %41 : vector<1x8x8xf32> to vector<1x8x8xbf16>
    %43 = vector.extract_strided_slice %9 {offsets = [0, 8], sizes = [8, 8], strides = [1, 1]} : vector<8x32xf32> to vector<8x8xf32>
    %44 = vector.shape_cast %43 : vector<8x8xf32> to vector<1x8x8xf32>
    %45 = arith.truncf %44 : vector<1x8x8xf32> to vector<1x8x8xbf16>
    %cst_15 = arith.constant dense<0.000000e+00> : vector<1x8x8xf32>
    %46 = tpu.matmul %39, %42, %cst_15 {dimension_numbers = #tpu.dot_dimension_numbers<[2], [2], [1], [1], [0, 0, 0, 1, 1, 1], [0], [0]>} : vector<1x8x8xbf16>, vector<1x8x8xbf16>, vector<1x8x8xf32> -> vector<1x8x8xf32>
    %cst_16 = arith.constant dense<0xFF800000> : vector<1x8xf32>
    %47 = vector.multi_reduction <maximumf>, %46, %cst_16 [2] : vector<1x8x8xf32> to vector<1x8xf32>
    %48 = vector.shape_cast %47 : vector<1x8xf32> to vector<1x8x1xf32>
    %49 = vector.broadcast %48 : vector<1x8x1xf32> to vector<1x8x8xf32>
    %50 = arith.subf %46, %49 : vector<1x8x8xf32>
    %51 = math.exp %50 : vector<1x8x8xf32>
    %cst_17 = arith.constant dense<0.000000e+00> : vector<1x8xf32>
    %52 = vector.multi_reduction <add>, %51, %cst_17 [2] : vector<1x8x8xf32> to vector<1x8xf32>
    %53 = vector.shape_cast %52 : vector<1x8xf32> to vector<1x8x1xf32>
    %54 = tpu.reciprocal %53 : vector<1x8x1xf32> -> vector<1x8x1xf32>
    %55 = vector.broadcast %54 : vector<1x8x1xf32> to vector<1x8x8xf32>
    %56 = arith.mulf %51, %55 : vector<1x8x8xf32>
    %c1 = arith.constant 1 : index
    %c0_18 = arith.constant 0 : index
    %c0_19 = arith.constant 0 : index
    %c0_20 = arith.constant 0 : index
    %57 = vector.load %arg15[%c1, %c0_18, %c0_19, %c0_20] : memref<4x1x8x8xf32, #tpu.memory_space<vmem>>, vector<1x1x8x8xf32>
    %58 = vector.shape_cast %57 : vector<1x1x8x8xf32> to vector<1x8x8xf32>
    %59 = vector.shape_cast %56 : vector<1x8x8xf32> to vector<1x1x8x8xf32>
    tpu.vector_store %arg15[%c1, %c0_18, %c0_19, %c0_20], %59 {strides = array<i32>} : memref<4x1x8x8xf32, #tpu.memory_space<vmem>>, vector<1x1x8x8xf32>,
    %60 = arith.truncf %56 : vector<1x8x8xf32> to vector<1x8x8xbf16>
    %cst_21 = arith.constant dense<0.000000e+00> : vector<1x8x8xf32>
    %61 = tpu.matmul %60, %45, %cst_21 {dimension_numbers = #tpu.dot_dimension_numbers<[2], [1], [1], [2], [0, 0, 0, 1, 1, 2], [0], [0]>} : vector<1x8x8xbf16>, vector<1x8x8xbf16>, vector<1x8x8xf32> -> vector<1x8x8xf32>
    %62 = vector.shape_cast %61 : vector<1x8x8xf32> to vector<8x8xf32>
    %c0_22 = arith.constant 0 : index
    %c8 = arith.constant 8 : index
    %63 = vector.load %arg16[%c0_22, %c8] : memref<8x32xf32, #tpu.memory_space<vmem>>, vector<8x8xf32>
    tpu.vector_store %arg16[%c0_22, %c8], %62 {strides = array<i32>} : memref<8x32xf32, #tpu.memory_space<vmem>>, vector<8x8xf32>,
    %64 = vector.extract_strided_slice %7 {offsets = [0, 16], sizes = [8, 8], strides = [1, 1]} : vector<8x32xf32> to vector<8x8xf32>
    %65 = vector.shape_cast %64 : vector<8x8xf32> to vector<1x8x8xf32>
    %66 = arith.truncf %65 : vector<1x8x8xf32> to vector<1x8x8xbf16>
    %67 = vector.extract_strided_slice %8 {offsets = [0, 16], sizes = [8, 8], strides = [1, 1]} : vector<8x32xf32> to vector<8x8xf32>
    %68 = vector.shape_cast %67 : vector<8x8xf32> to vector<1x8x8xf32>
    %69 = arith.truncf %68 : vector<1x8x8xf32> to vector<1x8x8xbf16>
    %70 = vector.extract_strided_slice %9 {offsets = [0, 16], sizes = [8, 8], strides = [1, 1]} : vector<8x32xf32> to vector<8x8xf32>
    %71 = vector.shape_cast %70 : vector<8x8xf32> to vector<1x8x8xf32>
    %72 = arith.truncf %71 : vector<1x8x8xf32> to vector<1x8x8xbf16>
    %cst_23 = arith.constant dense<0.000000e+00> : vector<1x8x8xf32>
    %73 = tpu.matmul %66, %69, %cst_23 {dimension_numbers = #tpu.dot_dimension_numbers<[2], [2], [1], [1], [0, 0, 0, 1, 1, 1], [0], [0]>} : vector<1x8x8xbf16>, vector<1x8x8xbf16>, vector<1x8x8xf32> -> vector<1x8x8xf32>
    %cst_24 = arith.constant dense<0xFF800000> : vector<1x8xf32>
    %74 = vector.multi_reduction <maximumf>, %73, %cst_24 [2] : vector<1x8x8xf32> to vector<1x8xf32>
    %75 = vector.shape_cast %74 : vector<1x8xf32> to vector<1x8x1xf32>
    %76 = vector.broadcast %75 : vector<1x8x1xf32> to vector<1x8x8xf32>
    %77 = arith.subf %73, %76 : vector<1x8x8xf32>
    %78 = math.exp %77 : vector<1x8x8xf32>
    %cst_25 = arith.constant dense<0.000000e+00> : vector<1x8xf32>
    %79 = vector.multi_reduction <add>, %78, %cst_25 [2] : vector<1x8x8xf32> to vector<1x8xf32>
    %80 = vector.shape_cast %79 : vector<1x8xf32> to vector<1x8x1xf32>
    %81 = tpu.reciprocal %80 : vector<1x8x1xf32> -> vector<1x8x1xf32>
    %82 = vector.broadcast %81 : vector<1x8x1xf32> to vector<1x8x8xf32>
    %83 = arith.mulf %78, %82 : vector<1x8x8xf32>
    %c2 = arith.constant 2 : index
    %c0_26 = arith.constant 0 : index
    %c0_27 = arith.constant 0 : index
    %c0_28 = arith.constant 0 : index
    %84 = vector.load %arg15[%c2, %c0_26, %c0_27, %c0_28] : memref<4x1x8x8xf32, #tpu.memory_space<vmem>>, vector<1x1x8x8xf32>
    %85 = vector.shape_cast %84 : vector<1x1x8x8xf32> to vector<1x8x8xf32>
    %86 = vector.shape_cast %83 : vector<1x8x8xf32> to vector<1x1x8x8xf32>
    tpu.vector_store %arg15[%c2, %c0_26, %c0_27, %c0_28], %86 {strides = array<i32>} : memref<4x1x8x8xf32, #tpu.memory_space<vmem>>, vector<1x1x8x8xf32>,
    %87 = arith.truncf %83 : vector<1x8x8xf32> to vector<1x8x8xbf16>
    %cst_29 = arith.constant dense<0.000000e+00> : vector<1x8x8xf32>
    %88 = tpu.matmul %87, %72, %cst_29 {dimension_numbers = #tpu.dot_dimension_numbers<[2], [1], [1], [2], [0, 0, 0, 1, 1, 2], [0], [0]>} : vector<1x8x8xbf16>, vector<1x8x8xbf16>, vector<1x8x8xf32> -> vector<1x8x8xf32>
    %89 = vector.shape_cast %88 : vector<1x8x8xf32> to vector<8x8xf32>
    %c0_30 = arith.constant 0 : index
    %c16 = arith.constant 16 : index
    %90 = vector.load %arg16[%c0_30, %c16] : memref<8x32xf32, #tpu.memory_space<vmem>>, vector<8x8xf32>
    tpu.vector_store %arg16[%c0_30, %c16], %89 {strides = array<i32>} : memref<8x32xf32, #tpu.memory_space<vmem>>, vector<8x8xf32>,
    %91 = vector.extract_strided_slice %7 {offsets = [0, 24], sizes = [8, 8], strides = [1, 1]} : vector<8x32xf32> to vector<8x8xf32>
    %92 = vector.shape_cast %91 : vector<8x8xf32> to vector<1x8x8xf32>
    %93 = arith.truncf %92 : vector<1x8x8xf32> to vector<1x8x8xbf16>
    %94 = vector.extract_strided_slice %8 {offsets = [0, 24], sizes = [8, 8], strides = [1, 1]} : vector<8x32xf32> to vector<8x8xf32>
    %95 = vector.shape_cast %94 : vector<8x8xf32> to vector<1x8x8xf32>
    %96 = arith.truncf %95 : vector<1x8x8xf32> to vector<1x8x8xbf16>
    %97 = vector.extract_strided_slice %9 {offsets = [0, 24], sizes = [8, 8], strides = [1, 1]} : vector<8x32xf32> to vector<8x8xf32>
    %98 = vector.shape_cast %97 : vector<8x8xf32> to vector<1x8x8xf32>
    %99 = arith.truncf %98 : vector<1x8x8xf32> to vector<1x8x8xbf16>
    %cst_31 = arith.constant dense<0.000000e+00> : vector<1x8x8xf32>
    %100 = tpu.matmul %93, %96, %cst_31 {dimension_numbers = #tpu.dot_dimension_numbers<[2], [2], [1], [1], [0, 0, 0, 1, 1, 1], [0], [0]>} : vector<1x8x8xbf16>, vector<1x8x8xbf16>, vector<1x8x8xf32> -> vector<1x8x8xf32>
    %cst_32 = arith.constant dense<0xFF800000> : vector<1x8xf32>
    %101 = vector.multi_reduction <maximumf>, %100, %cst_32 [2] : vector<1x8x8xf32> to vector<1x8xf32>
    %102 = vector.shape_cast %101 : vector<1x8xf32> to vector<1x8x1xf32>
    %103 = vector.broadcast %102 : vector<1x8x1xf32> to vector<1x8x8xf32>
    %104 = arith.subf %100, %103 : vector<1x8x8xf32>
    %105 = math.exp %104 : vector<1x8x8xf32>
    %cst_33 = arith.constant dense<0.000000e+00> : vector<1x8xf32>
    %106 = vector.multi_reduction <add>, %105, %cst_33 [2] : vector<1x8x8xf32> to vector<1x8xf32>
    %107 = vector.shape_cast %106 : vector<1x8xf32> to vector<1x8x1xf32>
    %108 = tpu.reciprocal %107 : vector<1x8x1xf32> -> vector<1x8x1xf32>
    %109 = vector.broadcast %108 : vector<1x8x1xf32> to vector<1x8x8xf32>
    %110 = arith.mulf %105, %109 : vector<1x8x8xf32>
    %c3 = arith.constant 3 : index
    %c0_34 = arith.constant 0 : index
    %c0_35 = arith.constant 0 : index
    %c0_36 = arith.constant 0 : index
    %111 = vector.load %arg15[%c3, %c0_34, %c0_35, %c0_36] : memref<4x1x8x8xf32, #tpu.memory_space<vmem>>, vector<1x1x8x8xf32>
    %112 = vector.shape_cast %111 : vector<1x1x8x8xf32> to vector<1x8x8xf32>
    %113 = vector.shape_cast %110 : vector<1x8x8xf32> to vector<1x1x8x8xf32>
    tpu.vector_store %arg15[%c3, %c0_34, %c0_35, %c0_36], %113 {strides = array<i32>} : memref<4x1x8x8xf32, #tpu.memory_space<vmem>>, vector<1x1x8x8xf32>,
    %114 = arith.truncf %110 : vector<1x8x8xf32> to vector<1x8x8xbf16>
    %cst_37 = arith.constant dense<0.000000e+00> : vector<1x8x8xf32>
    %115 = tpu.matmul %114, %99, %cst_37 {dimension_numbers = #tpu.dot_dimension_numbers<[2], [1], [1], [2], [0, 0, 0, 1, 1, 2], [0], [0]>} : vector<1x8x8xbf16>, vector<1x8x8xbf16>, vector<1x8x8xf32> -> vector<1x8x8xf32>
    %116 = vector.shape_cast %115 : vector<1x8x8xf32> to vector<8x8xf32>
    %c0_38 = arith.constant 0 : index
    %c24 = arith.constant 24 : index
    %117 = vector.load %arg16[%c0_38, %c24] : memref<8x32xf32, #tpu.memory_space<vmem>>, vector<8x8xf32>
    tpu.vector_store %arg16[%c0_38, %c24], %116 {strides = array<i32>} : memref<8x32xf32, #tpu.memory_space<vmem>>, vector<8x8xf32>,
    %c0_39 = arith.constant 0 : index
    %c0_40 = arith.constant 0 : index
    %118 = vector.load %arg16[%c0_39, %c0_40] : memref<8x32xf32, #tpu.memory_space<vmem>>, vector<8x32xf32>
    %119 = arith.truncf %118 : vector<8x32xf32> to vector<8x32xbf16>
    %c0_41 = arith.constant 0 : index
    %c0_42 = arith.constant 0 : index
    %120 = vector.load %arg4[%c0_41, %c0_42] : memref<32x32xbf16, #tpu.memory_space<vmem>>, vector<32x32xbf16>
    %cst_43 = arith.constant dense<0.000000e+00> : vector<8x32xf32>
    %121 = tpu.matmul %119, %120, %cst_43 {dimension_numbers = #tpu.dot_dimension_numbers<[1], [0], [0], [1], [0, 0, 1, 1], [], []>} : vector<8x32xbf16>, vector<32x32xbf16>, vector<8x32xf32> -> vector<8x32xf32>
    %c0_44 = arith.constant 0 : index
    %c0_45 = arith.constant 0 : index
    %122 = vector.load %arg5[%c0_44, %c0_45] : memref<1x32xf32, #tpu.memory_space<vmem>>, vector<1x32xf32>
    %123 = vector.broadcast %122 : vector<1x32xf32> to vector<8x32xf32>
    %124 = arith.addf %121, %123 : vector<8x32xf32>
    %125 = arith.addf %124, %0 : vector<8x32xf32>
    %cst_46 = arith.constant dense<0.000000e+00> : vector<8xf32>
    %126 = vector.multi_reduction <add>, %125, %cst_46 [1] : vector<8x32xf32> to vector<8xf32>
    %127 = vector.shape_cast %126 : vector<8xf32> to vector<8x1xf32>
    %cst_47 = arith.constant 3.200000e+01 : f32
    %128 = vector.broadcast %cst_47 : f32 to vector<8x1xf32>
    %129 = arith.divf %127, %128 : vector<8x1xf32>
    %130 = vector.broadcast %129 : vector<8x1xf32> to vector<8x32xf32>
    %131 = arith.subf %125, %130 : vector<8x32xf32>
    %132 = arith.mulf %131, %131 : vector<8x32xf32>
    %cst_48 = arith.constant dense<0.000000e+00> : vector<8xf32>
    %133 = vector.multi_reduction <add>, %132, %cst_48 [1] : vector<8x32xf32> to vector<8xf32>
    %134 = vector.shape_cast %133 : vector<8xf32> to vector<8x1xf32>
    %cst_49 = arith.constant 3.200000e+01 : f32
    %135 = vector.broadcast %cst_49 : f32 to vector<8x1xf32>
    %136 = arith.divf %134, %135 : vector<8x1xf32>
    %137 = vector.broadcast %129 : vector<8x1xf32> to vector<8x32xf32>
    %138 = arith.subf %125, %137 : vector<8x32xf32>
    %cst_50 = arith.constant 9.99999974E-6 : f32
    %139 = vector.broadcast %cst_50 : f32 to vector<8x1xf32>
    %140 = arith.addf %136, %139 : vector<8x1xf32>
    %141 = math.rsqrt %140 : vector<8x1xf32>
    %142 = vector.broadcast %141 : vector<8x1xf32> to vector<8x32xf32>
    %143 = arith.mulf %138, %142 : vector<8x32xf32>
    %c0_51 = arith.constant 0 : index
    %c0_52 = arith.constant 0 : index
    %144 = vector.load %arg6[%c0_51, %c0_52] : memref<1x32xf32, #tpu.memory_space<vmem>>, vector<1x32xf32>
    %145 = vector.broadcast %144 : vector<1x32xf32> to vector<8x32xf32>
    %146 = arith.mulf %143, %145 : vector<8x32xf32>
    %c0_53 = arith.constant 0 : index
    %c0_54 = arith.constant 0 : index
    %147 = vector.load %arg7[%c0_53, %c0_54] : memref<1x32xf32, #tpu.memory_space<vmem>>, vector<1x32xf32>
    %148 = vector.broadcast %147 : vector<1x32xf32> to vector<8x32xf32>
    %149 = arith.addf %146, %148 : vector<8x32xf32>
    %150 = arith.truncf %149 : vector<8x32xf32> to vector<8x32xbf16>
    %c0_55 = arith.constant 0 : index
    %c0_56 = arith.constant 0 : index
    %151 = vector.load %arg8[%c0_55, %c0_56] : memref<32x64xbf16, #tpu.memory_space<vmem>>, vector<32x64xbf16>
    %cst_57 = arith.constant dense<0.000000e+00> : vector<8x64xf32>
    %152 = tpu.matmul %150, %151, %cst_57 {dimension_numbers = #tpu.dot_dimension_numbers<[1], [0], [0], [1], [0, 0, 1, 1], [], []>} : vector<8x32xbf16>, vector<32x64xbf16>, vector<8x64xf32> -> vector<8x64xf32>
    %c0_58 = arith.constant 0 : index
    %c0_59 = arith.constant 0 : index
    %153 = vector.load %arg9[%c0_58, %c0_59] : memref<1x64xf32, #tpu.memory_space<vmem>>, vector<1x64xf32>
    %154 = vector.broadcast %153 : vector<1x64xf32> to vector<8x64xf32>
    %155 = arith.addf %152, %154 : vector<8x64xf32>
    %cst_60 = arith.constant 0.000000e+00 : f32
    %156 = vector.broadcast %cst_60 : f32 to vector<8x64xf32>
    %157 = arith.maximumf %155, %156 : vector<8x64xf32>
    %158 = arith.truncf %157 : vector<8x64xf32> to vector<8x64xbf16>
    %c0_61 = arith.constant 0 : index
    %c0_62 = arith.constant 0 : index
    %159 = vector.load %arg10[%c0_61, %c0_62] : memref<64x32xbf16, #tpu.memory_space<vmem>>, vector<64x32xbf16>
    %cst_63 = arith.constant dense<0.000000e+00> : vector<8x32xf32>
    %160 = tpu.matmul %158, %159, %cst_63 {dimension_numbers = #tpu.dot_dimension_numbers<[1], [0], [0], [1], [0, 0, 1, 1], [], []>} : vector<8x64xbf16>, vector<64x32xbf16>, vector<8x32xf32> -> vector<8x32xf32>
    %c0_64 = arith.constant 0 : index
    %c0_65 = arith.constant 0 : index
    %161 = vector.load %arg11[%c0_64, %c0_65] : memref<1x32xf32, #tpu.memory_space<vmem>>, vector<1x32xf32>
    %162 = vector.broadcast %161 : vector<1x32xf32> to vector<8x32xf32>
    %163 = arith.addf %160, %162 : vector<8x32xf32>
    %164 = arith.addf %163, %149 : vector<8x32xf32>
    %cst_66 = arith.constant dense<0.000000e+00> : vector<8xf32>
    %165 = vector.multi_reduction <add>, %164, %cst_66 [1] : vector<8x32xf32> to vector<8xf32>
    %166 = vector.shape_cast %165 : vector<8xf32> to vector<8x1xf32>
    %cst_67 = arith.constant 3.200000e+01 : f32
    %167 = vector.broadcast %cst_67 : f32 to vector<8x1xf32>
    %168 = arith.divf %166, %167 : vector<8x1xf32>
    %169 = vector.broadcast %168 : vector<8x1xf32> to vector<8x32xf32>
    %170 = arith.subf %164, %169 : vector<8x32xf32>
    %171 = arith.mulf %170, %170 : vector<8x32xf32>
    %cst_68 = arith.constant dense<0.000000e+00> : vector<8xf32>
    %172 = vector.multi_reduction <add>, %171, %cst_68 [1] : vector<8x32xf32> to vector<8xf32>
    %173 = vector.shape_cast %172 : vector<8xf32> to vector<8x1xf32>
    %cst_69 = arith.constant 3.200000e+01 : f32
    %174 = vector.broadcast %cst_69 : f32 to vector<8x1xf32>
    %175 = arith.divf %173, %174 : vector<8x1xf32>
    %176 = vector.broadcast %168 : vector<8x1xf32> to vector<8x32xf32>
    %177 = arith.subf %164, %176 : vector<8x32xf32>
    %cst_70 = arith.constant 9.99999974E-6 : f32
    %178 = vector.broadcast %cst_70 : f32 to vector<8x1xf32>
    %179 = arith.addf %175, %178 : vector<8x1xf32>
    %180 = math.rsqrt %179 : vector<8x1xf32>
    %181 = vector.broadcast %180 : vector<8x1xf32> to vector<8x32xf32>
    %182 = arith.mulf %177, %181 : vector<8x32xf32>
    %c0_71 = arith.constant 0 : index
    %c0_72 = arith.constant 0 : index
    %183 = vector.load %arg12[%c0_71, %c0_72] : memref<1x32xf32, #tpu.memory_space<vmem>>, vector<1x32xf32>
    %184 = vector.broadcast %183 : vector<1x32xf32> to vector<8x32xf32>
    %185 = arith.mulf %182, %184 : vector<8x32xf32>
    %c0_73 = arith.constant 0 : index
    %c0_74 = arith.constant 0 : index
    %186 = vector.load %arg13[%c0_73, %c0_74] : memref<1x32xf32, #tpu.memory_space<vmem>>, vector<1x32xf32>
    %187 = vector.broadcast %186 : vector<1x32xf32> to vector<8x32xf32>
    %188 = arith.addf %185, %187 : vector<8x32xf32>
    %c0_75 = arith.constant 0 : index
    %c0_76 = arith.constant 0 : index
    %189 = vector.load %arg14[%c0_75, %c0_76] : memref<8x32xf32, #tpu.memory_space<vmem>>, vector<8x32xf32>
    tpu.vector_store %arg14[%c0_75, %c0_76], %188 {strides = array<i32>} : memref<8x32xf32, #tpu.memory_space<vmem>>, vector<8x32xf32>,
    return
  }
  func.func @transform_0(%arg0: i32) -> (i32, i32) {
    %c0_i32 = arith.constant 0 : i32
    %c0_i32_0 = arith.constant 0 : i32
    return %arg0, %c0_i32 : i32, i32
  }
  func.func @transform_1(%arg0: i32) -> (i32, i32) {
    %c0_i32 = arith.constant 0 : i32
    %c0_i32_0 = arith.constant 0 : i32
    %c0_i32_1 = arith.constant 0 : i32
    return %c0_i32, %c0_i32_0 : i32, i32
  }
  func.func @transform_2(%arg0: i32) -> (i32, i32) {
    %c0_i32 = arith.constant 0 : i32
    %c0_i32_0 = arith.constant 0 : i32
    %c0_i32_1 = arith.constant 0 : i32
    return %c0_i32, %c0_i32_0 : i32, i32
  }
  func.func @transform_3(%arg0: i32) -> (i32, i32) {
    %c0_i32 = arith.constant 0 : i32
    %c0_i32_0 = arith.constant 0 : i32
    %c0_i32_1 = arith.constant 0 : i32
    return %c0_i32, %c0_i32_0 : i32, i32
  }
  func.func @transform_4(%arg0: i32) -> (i32, i32) {
    %c0_i32 = arith.constant 0 : i32
    %c0_i32_0 = arith.constant 0 : i32
    %c0_i32_1 = arith.constant 0 : i32
    return %c0_i32, %c0_i32_0 : i32, i32
  }
  func.func @transform_5(%arg0: i32) -> (i32, i32) {
    %c0_i32 = arith.constant 0 : i32
    %c0_i32_0 = arith.constant 0 : i32
    %c0_i32_1 = arith.constant 0 : i32
    return %c0_i32, %c0_i32_0 : i32, i32
  }
  func.func @transform_6(%arg0: i32) -> (i32, i32) {
    %c0_i32 = arith.constant 0 : i32
    %c0_i32_0 = arith.constant 0 : i32
    %c0_i32_1 = arith.constant 0 : i32
    return %c0_i32, %c0_i32_0 : i32, i32
  }
  func.func @transform_7(%arg0: i32) -> (i32, i32) {
    %c0_i32 = arith.constant 0 : i32
    %c0_i32_0 = arith.constant 0 : i32
    %c0_i32_1 = arith.constant 0 : i32
    return %c0_i32, %c0_i32_0 : i32, i32
  }
  func.func @transform_8(%arg0: i32) -> (i32, i32) {
    %c0_i32 = arith.constant 0 : i32
    %c0_i32_0 = arith.constant 0 : i32
    %c0_i32_1 = arith.constant 0 : i32
    return %c0_i32, %c0_i32_0 : i32, i32
  }
  func.func @transform_9(%arg0: i32) -> (i32, i32) {
    %c0_i32 = arith.constant 0 : i32
    %c0_i32_0 = arith.constant 0 : i32
    %c0_i32_1 = arith.constant 0 : i32
    return %c0_i32, %c0_i32_0 : i32, i32
  }
  func.func @transform_10(%arg0: i32) -> (i32, i32) {
    %c0_i32 = arith.constant 0 : i32
    %c0_i32_0 = arith.constant 0 : i32
    %c0_i32_1 = arith.constant 0 : i32
    return %c0_i32, %c0_i32_0 : i32, i32
  }
  func.func @transform_11(%arg0: i32) -> (i32, i32) {
    %c0_i32 = arith.constant 0 : i32
    %c0_i32_0 = arith.constant 0 : i32
    %c0_i32_1 = arith.constant 0 : i32
    return %c0_i32, %c0_i32_0 : i32, i32
  }
  func.func @transform_12(%arg0: i32) -> (i32, i32) {
    %c0_i32 = arith.constant 0 : i32
    %c0_i32_0 = arith.constant 0 : i32
    %c0_i32_1 = arith.constant 0 : i32
    return %c0_i32, %c0_i32_0 : i32, i32
  }
  func.func @transform_13(%arg0: i32) -> (i32, i32) {
    %c0_i32 = arith.constant 0 : i32
    %c0_i32_0 = arith.constant 0 : i32
    return %arg0, %c0_i32 : i32, i32
  }
  func.func @transform_14(%arg0: i32) -> (i32, i32, i32, i32) {
    %c0_i32 = arith.constant 0 : i32
    %c0_i32_0 = arith.constant 0 : i32
    %c0_i32_1 = arith.constant 0 : i32
    %c0_i32_2 = arith.constant 0 : i32
    return %c0_i32, %arg0, %c0_i32_0, %c0_i32_1 : i32, i32, i32, i32
  }
}

</mosaic_0001>

<bundles_post_ra>
// kernel: tpu_custom_call.1
= control target key start
LH: loop header
LB: loop body
LE: loop exit
PB: predicated region body
PF: predicated region fallthrough
CT: control target
= control target key end

     0   :  { %s2269_s0 = inlined_call_operand.vmem [shape: f32[16,32], index: 0, kind: input, shape index: {}]   ;;  %s2270_s1 = inlined_call_operand.vmem [shape: bf16[32,96], index: 1, kind: input, shape index: {}]   ;;  %s2271_s2 = inlined_call_operand.vmem [shape: f32[1,96], index: 2, kind: input, shape index: {}]   ;;  %s2272_s3 = inlined_call_operand.vmem [shape: bf16[32,32], index: 3, kind: input, shape index: {}]   ;;  %s2273_s4 = inlined_call_operand.vmem [shape: f32[1,32], index: 4, kind: input, shape index: {}]   ;;  %s2274_s5 = inlined_call_operand.vmem [shape: f32[1,32], index: 5, kind: input, shape index: {}]   ;;  %s2275_s6 = inlined_call_operand.vmem [shape: f32[1,32], index: 6, kind: input, shape index: {}]   ;;  %s2276_s7 = inlined_call_operand.hbm [shape: bf16[32,64], index: 7, kind: input, shape index: {}]   ;;  %s2277_s8 = inlined_call_operand.vmem [shape: f32[1,64], index: 8, kind: input, shape index: {}]   ;;  %s2278_s9 = inlined_call_operand.vmem [shape: bf16[64,32], index: 9, kind: input, shape index: {}]   ;;  %s2279_s10 = inlined_call_operand.vmem [shape: f32[1,32], index: 10, kind: input, shape index: {}]   ;;  %s2280_s11 = inlined_call_operand.vmem [shape: f32[1,32], index: 11, kind: input, shape index: {}]   ;;  %s2281_s12 = inlined_call_operand.vmem [shape: f32[1,32], index: 12, kind: input, shape index: {}]   ;;  %s2282_s13 = inlined_call_operand.hbm [shape: f32[16,32], index: 13, kind: output, shape index: {0}]   ;;  %s2283_s14 = inlined_call_operand.hbm [shape: f32[4,2,8,8], index: 14, kind: output, shape index: {1}]  }
   0x1   :  { %2293 = sst [smem:[#allocation16_spill]] %s2269_s0 }
   0x2   :  { %2294 = sst [smem:[#allocation17_spill]] %s2270_s1 }
   0x3   :  { %2295 = sst [smem:[#allocation18_spill]] %s2271_s2 }
   0x4   :  { %20 = vsyncpa [#allocation4], 0 }
   0x5   :  { %21 = vsyncpa [#allocation5], 0 }
   0x6   :  { %23 = vsyncpa [#allocation5 + $0x1], 0 }
   0x7   :  { %24 = vsyncpa [#allocation8], 0 }
   0x8   :  { %26 = vsyncpa [#allocation8 + $0x1], 0  ;;  %s1939_s29 = smov 0   ;;  %s1941_s30 = smov 0  }
   0x9   :  { %s1943_s15 = smov 0   ;;  %s1945_s16 = smov 0  }
   0xa LB: > { %2296 = sst [smem:[#allocation12_spill]] %s1835_s15  ;;  %s1960_s17 = sadd.s32 4294967295, %s1839_s16   ;;  %s1839_s16 = sphi %s1945_s16, %s2315_s16   ;;  %s1835_s15 = sphi %s1943_s15, %s2317_s15   ;;  %s1831_s30 = sphi %s1941_s30, %s2319_s30   ;;  %s1827_s29 = sphi %s1939_s29, %s2318_s29  }
   0xb   : > { %s1446_s18 = sadd.s32 4294967294, %s1839_s16   ;;  %s1964_s19 = sadd.s32 1, %s1839_s16  }
   0xc   : > { %2297 = sst [smem:[#allocation13_spill]] %s1964_s19  ;;  %s317_s20 = sadd.s32 1, %s1835_s15 }
   0xd   : > { %s314_s21 = ssub.s32 %s1839_s16, %s1964_s19  ;;  %p327_p0 = scmp.ne.s32.totalorder %s1835_s15, %s1831_s30 }
   0xe   : > { %p315_p1 = scmp.eq.s32.totalorder %s314_s21, 0  ;;  %p328_p2 = scmp.eq.s32.totalorder %s1960_s17, 1 }
   0xf   : > { %p333_p3 = scmp.ne.s32.totalorder %s1831_s30, %s1827_s29  ;;  %p334_p4 = scmp.eq.s32.totalorder %s1446_s18, 1 }
  0x10   : > { %s1975_s22 = scalar_select %p315_p1, %s1835_s15, %s317_s20  }
  0x11   : > { %p1977_p5 = por %p328_p2, %p327_p0  ;;  %p1981_p6 = por %p334_p4, %p333_p3 }
  0x12   : > { %2298 = sst [smem:[#allocation14_spill]] %s1975_s22  ;;  %p1447_p7 = scmp.ge.s32.totalorder %s1839_s16, 1 }
  0x13   : > { %s2299_s23 = scalar_select %p1977_p5, 1, 0 }
  0x14   : > { %s2300_s24 = scalar_select %p1981_p6, 1, 0 }
  0x15   : > { %p367_p8 = scmp.lt.s32.totalorder %s1839_s16, 3  ;;  %p2288_p9 = scmp.eq.s32.totalorder %s1960_s17, 0 }
  0x16   : > { %2301 = sst [smem:[#allocation15_spill]] %s2300_s24  ;;  %s1841_s26 = smov [#allocation3]  }
  0x17   : > { %p1988_p10 = pnand %p1447_p7, %p367_p8  ;;  %s397_s27 = sshll.u32 %s1841_s26, 4  ;;  %s398_s27 = int_to_ptr.vmem [resolvable:$true] %s397_s27 }
  0x18   : > { %s1713_s21 = scalar_lea.hbm %s2276_s7, 256 }
  0x19   : > { %s2302_s25 = scalar_select %p1988_p10, 1, 0 }
  0x1a   : > { %p1616_p11 = pneg %p1988_p10  ;;  %p1714_p13 = scmp.ne.s32.totalorder %s2276_s7, %s1713_s21 }
  0x1b   : > { %p1720_p3 = scmp.lt.u32.totalorder %s1713_s21, %s2276_s7 }
  0x1c   : > { %p1996_p12 = pnand %p2288_p9, %p1616_p11 }
  0x1e   : > { %p1715_p0 = pneg %p1996_p12 }
  0x20   : > { %p1716_p1 = pnand %p1715_p0, %p1714_p13 }
  0x22   : > { %p1717_p2 = pneg %p1716_p1 }
  0x24   : > { %p1722_p4 = pnand %p1720_p3, %p1717_p2 }
  0x26   : > { %1725 = shalt.err (!%p1722_p4)
}
  0x27   : > { %s1726_s24 = scalar_lea.vmem %s398_s27, 256  ;;  %p1734_p9 = scmp.lt.s32.totalorder %s398_s27, %s398_s27 }
  0x28   : > { %p1727_p7 = scmp.ne.s32.totalorder %s398_s27, %s1726_s24  ;;  %p1735_p6 = scmp.lt.s32.totalorder %s1726_s24, %s1726_s24 }
  0x2a   : > { %p1729_p8 = pnand %p1727_p7, %p1715_p0  ;;  %p1736_p5 = por %p1735_p6, %p1734_p9 }
  0x2c   : > { %p1730_p11 = pneg %p1729_p8 }
  0x2e   : > { %p1737_p10 = pnand %p1736_p5, %p1730_p11 }
  0x30   : > { %1740 = shalt.err (!%p1737_p10)
}
  0x31   : > { %s1842_s15 = smov 64   ;;  %s1843_s22 = smov 4  }
  0x32   : > { %1619 = dma.hbm_to_vmem [thread:$0]  (!%p1996_p12), %s2276_s7, 256, %s398_s27, [#allocation4], %s1842_s15, %s1842_s15, %s1843_s22  }
  0x33   : > { %p2304_p13 = scmp.ne.s32.totalorder %s2302_s25, 0 }
  0x34   : > { %p2305_p1 = scmp.eq.s32.totalorder (!%p2304_p13), %s1960_s17, 0 }
  0x35   : > { %435 = sbr.rel (%p2304_p13) target bundleno = 2634 (0xa4a), region = 72 }
  0x3c   : > { %1814 = dma.done.wait (%p2305_p1), [#allocation4], 256   ;;  %p2306_p0 = pmov %p2305_p1 }
  0x3d   : > { %p485_p5 = scmp.lt.s32.totalorder %s1960_s17, 1  ;;  %v1844_v0 = vmov 0.0   ;;  %vm1845_vm0 = vmmov 0   ;;  %s2307_s0 = sld [smem:[#allocation16_spill]]  ;;  %vm515_vm1 = vcmask 261120   ;;  %vm563_vm2 = vcmask 64512  }
  0x3e   : > { %1816 = vsyncadd (%p2306_p0), [#allocation4], 4294967040  ;;  %1524 = vmatprep.subr.bf16.mxu0 %v1844_v0  ;;  %1528 = vmatprep.mubr.msk.bf16.mxu0 %vm1845_vm0, %v1844_v0  ;;  %s2308_s1 = sld [smem:[#allocation17_spill]]  ;;  %s2309_s2 = sld [smem:[#allocation18_spill]]  ;;  %vm628_vm3 = vcmask 1043456   ;;  %vm789_vm4 = vcmask 130112  }
  0x3f   : > { %s486_s19 = scalar_select %p485_p5, %s1960_s17, 1  ;;  %1532 = vmatprep.subr.bf16.mxu1 %v1844_v0  ;;  %1534 = vmatprep.mubr.msk.bf16.mxu1 %vm1845_vm0, %v1844_v0  ;;  %vm907_vm5 = vcmask 195712   ;;  %vm1025_vm6 = vcmask 261312   ;;  %vm1234_vm7 = vcmask 523264  }
  0x40   : > { %s1848_s25 = smov 80   ;;  %s1849_s27 = smov 88  }
  0x41   : > { %s1454_s24 = sshll.u32 %s486_s19, 3  ;;  %s1846_s19 = smov 120  }
  0x42   : > { %s1851_s21 = smov 112   ;;  %s1852_s26 = smov 104  }
  0x43   : > { %s488_s28 = scalar_lea.vmem %s2307_s0, %s1454_s24  ;;  %s1847_s24 = smov 96  }
  0x44   : > { %v1683_v1 = vld [vmem:[%s2308_s1] sm:$0xff]   ;;  %v1684_v2 = vld [vmem:[%s2308_s1 + $0x8] sm:$0xff]   ;;  %s1853_s15 = smov 56   ;;  %s1854_s22 = smov 64  }
  0x45   : > { %1525 = vmatpush3.bf16.msra.mxu0 %v1683_v1  ;;  %v2039_v3 = vld [vmem:[%s488_s28] sm:$0xff]  ;;  %s1850_s28 = smov 72   ;;  %s1855_s18 = smov 40  }
  0x46   : > { %1526 = vmatprep.subr.bf16.mxu0 %v1844_v0  ;;  %v491_v4 = vpack.c.bf16 %v2039_v3, %v2039_v3  ;;  %v1455_v5 = vld [vmem:[%s2309_s2] ss:$0 sm:$0xff]  ;;  %s1856_s20 = smov 48   ;;  %p2310_p9 = scmp.ne.s32.totalorder %s2299_s23, 0 }
  0x49   : > { %1527 = vmatpush3.bf16.msra.mxu0 %v1684_v2 }
  0x4a   : > { %1538 = vmatprep.subr.bf16.mxu0 %v1844_v0 }
  0x4c   : > { %1529 = vmatmul.mubr.msk.bf16.vlgmr.msra.gmra.mrb[0].mxu0 %vm515_vm1, %v491_v4 }
  0x4d   : > { %1540 = vmatprep.mubr.msk.bf16.mxu0 %vm1845_vm0, %v1844_v0 }
 0x11f   : > { %v553_v6 = vpop.f32.mrb[0].mxu0 }
 0x120   : > { %v554_v7 = vadd.f32 %v1455_v5, %v553_v6  ;;  %v1530_v8 = vpop.f32.mrb[1].mxu0 }
 0x121   : > { %v556_v9 = vpop.f32.mrb[2].mxu0 }
 0x122   : > { %v2051_v10 = vpack.c.bf16 %v554_v7, %v554_v7  ;;  %v1531_v11 = vpop.f32.mrb[3].mxu0 }
 0x124   : > { %673 = vrot.lane.b32.xlu1 %v2051_v10, %s1846_s19  ;;  %561 = vrot.lane.b32.xlu0 %v2051_v10, %s1847_s24  ;;  %s2094_s19 = sand.u32 1, %s1831_s30  }
 0x125   : > { %s1453_s24 = sshll.u32 %s2094_s19, 5 }
 0x128   : > { %793 = vrot.lane.b32.xlu1 %v2051_v10, %s1848_s25  ;;  %675 = vrot.lane.b32.xlu0 %v2051_v10, %s1849_s27  ;;  %s2097_s25 = scalar_lea.vmem [#allocation7], %s1453_s24  ;;  %s2291_s27 = smov 8  }
 0x129   : > { %s1860_s24 = smov [#allocation7]  }
 0x12c   : > { %911 = vrot.lane.b32.xlu1 %v2051_v10, %s1850_s28  ;;  %791 = vrot.lane.b32.xlu0 %v2051_v10, %s1851_s21  ;;  %s2292_s28 = sshll.u32 %s1960_s17, 7 }
 0x130   : > { %909 = vrot.lane.b32.xlu0 %v2051_v10, %s1852_s26 }
 0x196   : > { %v562_v12 = vpop.permute.xlu0 %561  ;;  %v674_v15 = vpop.permute.xlu1 %673 }
 0x197   : > { %v568_v13 = vsel %vm563_vm2, %v562_v12, 0 }
 0x198   : > { %1533 = vmatpush3.bf16.xpose.msra.mxu1 %v568_v13 }
 0x199   : > { %1544 = vmatprep.subr.bf16.mxu1 %v1844_v0 }
 0x19a   : > { %v676_v14 = vpop.permute.xlu0 %675  ;;  %v794_v17 = vpop.permute.xlu1 %793 }
 0x19b   : > { %v681_v16 = vsel %vm563_vm2, %v676_v14, 0  ;;  %v799_v18 = vsel %vm563_vm2, %v794_v17, 0 }
 0x19e   : > { %v912_v19 = vpop.permute.xlu1 %911  ;;  %v792_v20 = vpop.permute.xlu0 %791 }
 0x19f   : > { %1535 = vmatmul.mubr.msk.bf16.vlgmr.msra.gmra.mrb[0].mxu1 %vm563_vm2, %v2051_v10  ;;  %v917_v21 = vsel %vm563_vm2, %v912_v19, 0 }
 0x1a0   : > { %1545 = vmatpush3.bf16.xpose.msra.mxu1 %v681_v16  ;;  %1546 = vmatprep.mubr.msk.bf16.mxu1 %vm1845_vm0, %v1844_v0 }
 0x1a1   : > { %1556 = vmatprep.subr.bf16.mxu1 %v1844_v0 }
 0x1a2   : > { %v910_v22 = vpop.permute.xlu0 %909 }
 0x1a7   : > { %1547 = vmatmul.mubr.msk.bf16.vlgmr.msra.gmra.mrb[4].mxu1 %vm563_vm2, %v674_v15 }
 0x1a8   : > { %1557 = vmatpush3.bf16.xpose.msra.mxu1 %v799_v18  ;;  %1558 = vmatprep.mubr.msk.bf16.mxu1 %vm1845_vm0, %v1844_v0 }
 0x1a9   : > { %1568 = vmatprep.subr.bf16.mxu1 %v1844_v0 }
 0x1af   : > { %1559 = vmatmul.mubr.msk.bf16.vlgmr.msra.gmra.mrb[8].mxu1 %vm563_vm2, %v792_v20 }
 0x1b0   : > { %1569 = vmatpush3.bf16.xpose.msra.mxu1 %v917_v21  ;;  %1570 = vmatprep.mubr.msk.bf16.mxu1 %vm1845_vm0, %v1844_v0 }
 0x1b1   : > { %1580 = vmatprep.subr.bf16.mxu1 %v1844_v0 }
 0x1b7   : > { %1571 = vmatmul.mubr.msk.bf16.vlgmr.msra.gmra.mrb[12].mxu1 %vm563_vm2, %v910_v22 }
 0x1b8   : > { %1584 = vmatprep.mubr.msk.bf16.mxu1 %vm1845_vm0, %v1844_v0 }
 0x272   : > { %v604_v23 = vpop.f32.mrb[0].mxu1 }
 0x273   : > { %v1536_v24 = vpop.f32.mrb[1].mxu1  ;;  %v610_v25 = vsel %vm563_vm2, %v604_v23, -inf }
 0x274   : > { %611 = vmax.xlane.f32.xlu1 %v610_v25  ;;  %v607_v26 = vpop.f32.mrb[2].mxu1 }
 0x275   : > { %v1537_v27 = vpop.f32.mrb[3].mxu1 }
 0x27a   : > { %v717_v28 = vpop.f32.mrb[4].mxu1 }
 0x27b   : > { %v1548_v29 = vpop.f32.mrb[5].mxu1  ;;  %v723_v30 = vsel %vm563_vm2, %v717_v28, -inf }
 0x27c   : > { %724 = vmax.xlane.f32.xlu0 %v723_v30  ;;  %v720_v31 = vpop.f32.mrb[6].mxu1 }
 0x27d   : > { %v1549_v32 = vpop.f32.mrb[7].mxu1 }
 0x282   : > { %v835_v33 = vpop.f32.mrb[8].mxu1 }
 0x283   : > { %v1560_v34 = vpop.f32.mrb[9].mxu1  ;;  %v841_v35 = vsel %vm563_vm2, %v835_v33, -inf }
 0x284   : > { %842 = vmax.xlane.f32.xlu0 %v841_v35  ;;  %v838_v36 = vpop.f32.mrb[10].mxu1  ;;  %v1686_v34 = vld [vmem:[%s2272_s3 + $0x8] sm:$0xff]  }
 0x285   : > { %v1561_v37 = vpop.f32.mrb[11].mxu1 }
 0x28a   : > { %v953_v38 = vpop.f32.mrb[12].mxu1 }
 0x28b   : > { %v1572_v39 = vpop.f32.mrb[13].mxu1  ;;  %v959_v40 = vsel %vm563_vm2, %v953_v38, -inf }
 0x28c   : > { %960 = vmax.xlane.f32.xlu1 %v959_v40  ;;  %v956_v41 = vpop.f32.mrb[14].mxu1 }
 0x28d   : > { %v1573_v42 = vpop.f32.mrb[15].mxu1 }
 0x301   : > { %v612_v43 = vpop.xlane.xlu1 %611 }
 0x302   : > { %v613_v44 = vsub.f32 %v604_v23, %v612_v43 }
 0x304   : > { %v614_v45 = vmul.f32 1.442695, %v613_v44 }
 0x306   : > { %1693 = vpow2.f32 %v614_v45 }
 0x309   : > { %v725_v46 = vpop.xlane.xlu0 %724 }
 0x30a   : > { %v726_v47 = vsub.f32 %v717_v28, %v725_v46 }
 0x30c   : > { %v727_v48 = vmul.f32 1.442695, %v726_v47 }
 0x30e   : > { %1695 = vpow2.f32 %v727_v48  ;;  %v1470_v48 = vld [vmem:[%s2273_s4] ss:$0 sm:$0xff] }
 0x310   : > { %v1694_v49 = vpop.eup %1693 }
 0x311   : > { %v843_v50 = vpop.xlane.xlu0 %842  ;;  %v616_v51 = vsel %vm563_vm2, %v1694_v49, 0.0 }
 0x312   : > { %v844_v52 = vsub.f32 %v835_v33, %v843_v50  ;;  %617 = vadd.xlane.f32.xlu0 %v616_v51  ;;  %v1685_v33 = vld [vmem:[%s2272_s3] sm:$0xff]  }
 0x313   : > { %1581 = vmatpush3.bf16.msra.mxu1 %v1685_v33 }
 0x314   : > { %v845_v53 = vmul.f32 1.442695, %v844_v52  ;;  %1582 = vmatprep.subr.bf16.mxu1 %v1844_v0 }
 0x316   : > { %1697 = vpow2.f32 %v845_v53 }
 0x317   : > { %1583 = vmatpush3.bf16.msra.mxu1 %v1686_v34 }
 0x318   : > { %v1696_v54 = vpop.eup %1695  ;;  %1596 = vmatprep.subr.bf16.mxu1 %v1844_v0 }
 0x319   : > { %v729_v55 = vsel %vm563_vm2, %v1696_v54, 0.0  ;;  %v961_v58 = vpop.xlane.xlu1 %960 }
 0x31a   : > { %730 = vadd.xlane.f32.xlu1 %v729_v55  ;;  %v962_v59 = vsub.f32 %v953_v38, %v961_v58 }
 0x31c   : > { %v963_v60 = vmul.f32 1.442695, %v962_v59 }
 0x31e   : > { %1699 = vpow2.f32 %v963_v60 }
 0x320   : > { %v1698_v56 = vpop.eup %1697 }
 0x321   : > { %v847_v57 = vsel %vm563_vm2, %v1698_v56, 0.0 }
 0x322   : > { %848 = vadd.xlane.f32.xlu0 %v847_v57 }
 0x328   : > { %v1700_v61 = vpop.eup %1699 }
 0x329   : > { %v965_v62 = vsel %vm563_vm2, %v1700_v61, 0.0 }
 0x32b   : > { %737 = vrot.lane.b32.xlu1 %v2051_v10, %s1853_s15  ;;  %s2183_s15 = scalar_lea.hbm %s2283_s14, %s2292_s28 }
 0x338   : > { %623 = vrot.lane.b32.xlu0 %v2051_v10, %s1854_s22  ;;  %s1858_s22 = smov 16  }
 0x33c   : > { %973 = vrot.lane.b32.xlu0 %v2051_v10, %s1855_s18  ;;  %s1859_s18 = smov 24  }
 0x34f   : > { %966 = vadd.xlane.f32.xlu1 %v965_v62  ;;  %v1688_v62 = vld [vmem:[#allocation3 + $0x8] sm:$0xff]  }
 0x360   : > { %855 = vrot.lane.b32.xlu1 %v2051_v10, %s1856_s20 }
 0x39f   : > { %v618_v63 = vpop.xlane.xlu0 %617 }
 0x3a0   : > { %1701 = vrcp.f32 %v618_v63  ;;  %v1690_v63 = vld [vmem:[%s2278_s9 + $0x8] sm:$0xff]  }
 0x3a7   : > { %v731_v1 = vpop.xlane.xlu1 %730 }
 0x3a8   : > { %1703 = vrcp.f32 %v731_v1 }
 0x3aa   : > { %v1702_v2 = vpop.eup %1701 }
 0x3ab   : > { %v620_v4 = vmul.f32 %v1702_v2, %v1694_v49  ;;  %v738_v10 = vpop.permute.xlu1 %737 }
 0x3ac   : > { %v743_v12 = vsel %vm628_vm3, %v738_v10, 0 }
 0x3ad   : > { %621 = vst.msk [vmem:[%s2097_s25] sm:$0xff] %vm563_vm2, %v620_v4  ;;  %v622_v11 = vpack.c.bf16 %v620_v4, %v620_v4 }
 0x3af   : > { %v849_v5 = vpop.xlane.xlu0 %848 }
 0x3b0   : > { %1705 = vrcp.f32 %v849_v5 }
 0x3b2   : > { %v1704_v6 = vpop.eup %1703 }
 0x3b3   : > { %v733_v7 = vmul.f32 %v1704_v6, %v1696_v54  ;;  %v624_v8 = vpop.permute.xlu0 %623  ;;  %v1474_v6 = vld [vmem:[%s2274_s5] ss:$0 sm:$0xff] }
 0x3b4   : > { %v630_v9 = vsel %vm628_vm3, %v624_v8, 0  ;;  %v1475_v8 = vld [vmem:[%s2275_s6] ss:$0 sm:$0xff] }
 0x3b5   : > { %1539 = vmatpush3.bf16.msra.mxu0 %v630_v9  ;;  %1462 = vst.msk [vmem:[%s2097_s25 + $0x8] sm:$0xff] %vm563_vm2, %v733_v7  ;;  %v736_v15 = vpack.c.bf16 %v733_v7, %v733_v7 }
 0x3b6   : > { %1550 = vmatprep.subr.bf16.mxu0 %v1844_v0 }
 0x3b7   : > { %v974_v19 = vpop.permute.xlu0 %973 }
 0x3b8   : > { %1541 = vmatmul.mubr.msk.bf16.vlgmr.msra.gmra.mrb[4].mxu0 %vm563_vm2, %v622_v11  ;;  %v979_v21 = vsel %vm628_vm3, %v974_v19, 0 }
 0x3b9   : > { %1551 = vmatpush3.bf16.msra.mxu0 %v743_v12  ;;  %1552 = vmatprep.mubr.msk.bf16.mxu0 %vm1845_vm0, %v1844_v0  ;;  %v1691_v12 = vld [vmem:[%s2278_s9 + $0x10] sm:$0xff]  }
 0x3ba   : > { %v1706_v13 = vpop.eup %1705  ;;  %1562 = vmatprep.subr.bf16.mxu0 %v1844_v0 }
 0x3bb   : > { %v851_v14 = vmul.f32 %v1706_v13, %v1698_v56  ;;  %v1692_v13 = vld [vmem:[%s2278_s9 + $0x18] sm:$0xff]  }
 0x3bd   : > { %1465 = vst.msk [vmem:[%s2097_s25 + $0x10] sm:$0xff] %vm563_vm2, %v851_v14  ;;  %v854_v20 = vpack.c.bf16 %v851_v14, %v851_v14  ;;  %v1476_v14 = vld [vmem:[%s2277_s8] ss:$0 sm:$0xff] }
 0x3c0   : > { %1553 = vmatmul.mubr.msk.bf16.vlgmr.msra.gmra.mrb[8].mxu0 %vm563_vm2, %v736_v15 }
 0x3c1   : > { %1564 = vmatprep.mubr.msk.bf16.mxu0 %vm1845_vm0, %v1844_v0 }
 0x3dc   : > { %v967_v16 = vpop.xlane.xlu1 %966 }
 0x3dd   : > { %1707 = vrcp.f32 %v967_v16 }
 0x3e0   : > { %v856_v17 = vpop.permute.xlu1 %855 }
 0x3e1   : > { %v861_v18 = vsel %vm628_vm3, %v856_v17, 0 }
 0x3e2   : > { %1563 = vmatpush3.bf16.msra.mxu0 %v861_v18 }
 0x3e3   : > { %1574 = vmatprep.subr.bf16.mxu0 %v1844_v0 }
 0x3e5   : > { %1565 = vmatmul.mubr.msk.bf16.vlgmr.msra.gmra.mrb[12].mxu0 %vm563_vm2, %v854_v20 }
 0x3e6   : > { %1575 = vmatpush3.bf16.msra.mxu0 %v979_v21  ;;  %1576 = vmatprep.mubr.msk.bf16.mxu0 %vm1845_vm0, %v1844_v0 }
 0x3e7   : > { %v1708_v22 = vpop.eup %1707  ;;  %1588 = vmatprep.subr.bf16.mxu0 %v1844_v0 }
 0x3e8   : > { %v969_v23 = vmul.f32 %v1708_v22, %v1700_v61  ;;  %v1687_v61 = vld [vmem:[#allocation3] sm:$0xff]  }
 0x3ea   : > { %v972_v24 = vpack.c.bf16 %v969_v23, %v969_v23  ;;  %1468 = vst.msk [vmem:[%s2097_s25 + $0x18] sm:$0xff] %vm563_vm2, %v969_v23 }
 0x3ed   : > { %1577 = vmatmul.mubr.msk.bf16.vlgmr.msra.gmra.mrb[16].mxu0 %vm563_vm2, %v972_v24 }
 0x3ee   : > { %1592 = vmatprep.mubr.msk.bf16.mxu0 %vm1845_vm0, %v1844_v0  ;;  %1589 = vmatpush3.bf16.msra.mxu0 %v1687_v61 }
 0x3ef   : > { %1590 = vmatprep.subr.bf16.mxu0 %v1844_v0 }
 0x3f2   : > { %1591 = vmatpush3.bf16.msra.mxu0 %v1688_v62 }
 0x48b   : > { %v666_v25 = vpop.f32.mrb[4].mxu0 }
 0x48c   : > { %672 = vst.msk [vmem:[#allocation2] sm:$0xff] %vm563_vm2, %v666_v25  ;;  %v1542_v26 = vpop.f32.mrb[5].mxu0 }
 0x48d   : > { %v669_v27 = vpop.f32.mrb[6].mxu0 }
 0x48e   : > { %v1543_v28 = vpop.f32.mrb[7].mxu0 }
 0x493   : > { %v779_v29 = vpop.f32.mrb[8].mxu0 }
 0x494   : > { %786 = vrot.lane.b32.xlu1 %v779_v29, %s2291_s27  ;;  %v1554_v30 = vpop.f32.mrb[9].mxu0  ;;  %s1745_s27 = sshll.u32 %s1860_s24, 4  ;;  %s1746_s27 = int_to_ptr.vmem [resolvable:$false] %s1745_s27 }
 0x495   : > { %v782_v31 = vpop.f32.mrb[10].mxu0  ;;  %s1747_s0 = scalar_lea.vmem %s1746_s27, 1024 }
 0x496   : > { %v1555_v32 = vpop.f32.mrb[11].mxu0 }
 0x4b8   : > { %v897_v35 = vpop.f32.mrb[12].mxu0 }
 0x4b9   : > { %904 = vrot.lane.b32.xlu0 %v897_v35, %s1858_s22  ;;  %v1566_v36 = vpop.f32.mrb[13].mxu0  ;;  %s1340_s22 = sshll.u32 %s2097_s25, 4  ;;  %s2186_s22 = int_to_ptr.vmem [resolvable:$true] %s1340_s22 }
 0x4ba   : > { %v900_v37 = vpop.f32.mrb[14].mxu0  ;;  %s1741_s20 = scalar_lea.vmem %s2186_s22, 512  ;;  %p1748_p2 = scmp.lt.s32.totalorder %s2186_s22, %s1746_s27 }
 0x4bb   : > { %v1567_v38 = vpop.f32.mrb[15].mxu0  ;;  %p1742_p6 = scmp.ne.s32.totalorder %s2186_s22, %s1741_s20  ;;  %p1749_p3 = scmp.lt.s32.totalorder %s1747_s0, %s1741_s20 }
 0x4bd   : > { %p1743_p10 = pnand %p1742_p6, %p2310_p9  ;;  %p1750_p4 = por %p1749_p3, %p1748_p2 }
 0x4bf   : > { %p1744_p12 = pneg %p1743_p10 }
 0x4c0   : > { %v1015_v39 = vpop.f32.mrb[16].mxu0 }
 0x4c1   : > { %1022 = vrot.lane.b32.xlu1 %v1015_v39, %s1859_s18  ;;  %v1578_v40 = vpop.f32.mrb[17].mxu0  ;;  %s1315_s18 = scalar_lea.sflag [#allocation8], %s2094_s19  ;;  %p1751_p7 = pnand %p1750_p4, %p1744_p12 }
 0x4c2   : > { %v1018_v41 = vpop.f32.mrb[18].mxu0 }
 0x4c3   : > { %v1579_v42 = vpop.f32.mrb[19].mxu0 }
 0x506   : > { %v787_v43 = vpop.permute.xlu1 %786 }
 0x507   : > { %790 = vst.msk [vmem:[#allocation2] sm:$0xff] %vm789_vm4, %v787_v43 }
 0x52b   : > { %v905_v44 = vpop.permute.xlu0 %904 }
 0x52c   : > { %908 = vst.msk [vmem:[#allocation2] sm:$0xff] %vm907_vm5, %v905_v44 }
 0x533   : > { %v1023_v45 = vpop.permute.xlu1 %1022 }
 0x534   : > { %1026 = vst.msk [vmem:[#allocation2] sm:$0xff] %vm1025_vm6, %v1023_v45 }
 0x53b   : > { %v1027_v46 = vld [vmem:[#allocation2] sm:$0xff] }
 0x53c   : > { %v1028_v47 = vpack.c.bf16 %v1027_v46, %v1027_v46 }
 0x53e   : > { %1585 = vmatmul.mubr.msk.bf16.vlgmr.msra.gmra.mrb[16].mxu1 %vm515_vm1, %v1028_v47 }
 0x53f   : > { %1604 = vmatprep.mubr.msk.bf16.mxu1 %vm1845_vm0, %v1844_v0 }
 0x611   : > { %v1089_v49 = vpop.f32.mrb[16].mxu1 }
 0x612   : > { %v1090_v50 = vadd.f32 %v1470_v48, %v1089_v49  ;;  %v1586_v51 = vpop.f32.mrb[17].mxu1 }
 0x613   : > { %v1092_v52 = vpop.f32.mrb[18].mxu1 }
 0x614   : > { %v1587_v53 = vpop.f32.mrb[19].mxu1  ;;  %v1095_v54 = vadd.f32 %v1090_v50, %v2039_v3  ;;  %v1689_v3 = vld [vmem:[%s2278_s9] sm:$0xff]  }
 0x615   : > { %1597 = vmatpush3.bf16.msra.mxu1 %v1689_v3 }
 0x616   : > { %v1096_v55 = vsel %vm515_vm1, %v1095_v54, 0.0  ;;  %1598 = vmatprep.subr.bf16.mxu1 %v1844_v0 }
 0x617   : > { %1097 = vadd.xlane.f32.xlu0 %v1096_v55 }
 0x619   : > { %1599 = vmatpush3.bf16.msra.mxu1 %v1690_v63 }
 0x61a   : > { %1600 = vmatprep.subr.bf16.mxu1 %v1844_v0 }
 0x61d   : > { %1601 = vmatpush3.bf16.msra.mxu1 %v1691_v12 }
 0x61e   : > { %1602 = vmatprep.subr.bf16.mxu1 %v1844_v0  ;;  %v1480_v0 = vld [vmem:[%s2279_s10] ss:$0 sm:$0xff] }
 0x621   : > { %1603 = vmatpush3.bf16.msra.mxu1 %v1692_v13 }
 0x6a4   : > { %v1098_v56 = vpop.xlane.xlu0 %1097 }
 0x6a5   : > { %v1100_v57 = vmul.f32 0.03125, %v1098_v56 }
 0x6a7   : > { %v1101_v58 = vsub.f32 %v1095_v54, %v1100_v57 }
 0x6a9   : > { %v1102_v59 = vmul.f32 %v1101_v58, %v1101_v58 }
 0x6ab   : > { %v1103_v60 = vsel %vm515_vm1, %v1102_v59, 0.0 }
 0x6ac   : > { %1104 = vadd.xlane.f32.xlu1 %v1103_v60 }
 0x739   : > { %v1105_v1 = vpop.xlane.xlu1 %1104 }
 0x73a   : > { %v1106_v2 = vmul.f32 0.03125, %v1105_v1 }
 0x73c   : > { %v1107_v4 = vadd.f32 1e-05, %v1106_v2 }
 0x73e   : > { %1709 = vrsqrt.f32 %v1107_v4 }
 0x748   : > { %v1710_v5 = vpop.eup %1709 }
 0x749   : > { %v1109_v7 = vmul.f32 %v1710_v5, %v1101_v58 }
 0x74b   : > { %v1117_v9 = vmul.f32 %v1474_v6, %v1109_v7 }
 0x74d   : > { %v1125_v10 = vadd.f32 %v1475_v8, %v1117_v9 }
 0x74f   : > { %v1126_v11 = vpack.c.bf16 %v1125_v10, %v1125_v10 }
 0x751   : > { %1593 = vmatmul.mubr.msk.bf16.vlgmr.msra.gmra.mrb[20].mxu0 %vm515_vm1, %v1126_v11 }
 0x824   : > { %v1187_v15 = vpop.f32.mrb[20].mxu0 }
 0x825   : > { %v1188_v16 = vadd.f32 %v1476_v14, %v1187_v15  ;;  %v1594_v17 = vpop.f32.mrb[21].mxu0 }
 0x826   : > { %v1190_v18 = vpop.f32.mrb[22].mxu0 }
 0x827   : > { %v1193_v19 = vmax.f32 %v1188_v16, 0.0  ;;  %v1595_v20 = vpop.f32.mrb[23].mxu0 }
 0x829   : > { %v1194_v21 = vpack.c.bf16 %v1193_v19, %v1193_v19 }
 0x82b   : > { %1605 = vmatmul.mubr.msk.bf16.vlgmr.msra.gmra.mrb[20].mxu1 %vm1234_vm7, %v1194_v21 }
 0x8fe   : > { %v1272_v22 = vpop.f32.mrb[20].mxu1 }
 0x8ff   : > { %v1273_v23 = vadd.f32 %v1480_v0, %v1272_v22  ;;  %v1606_v24 = vpop.f32.mrb[21].mxu1 }
 0x900   : > { %v1275_v25 = vpop.f32.mrb[22].mxu1 }
 0x901   : > { %v1607_v26 = vpop.f32.mrb[23].mxu1  ;;  %v1278_v27 = vadd.f32 %v1273_v23, %v1125_v10 }
 0x903   : > { %v1279_v28 = vsel %vm515_vm1, %v1278_v27, 0.0 }
 0x904   : > { %1280 = vadd.xlane.f32.xlu0 %v1279_v28 }
 0x991   : > { %v1281_v29 = vpop.xlane.xlu0 %1280 }
 0x992   : > { %v1282_v30 = vmul.f32 0.03125, %v1281_v29 }
 0x994   : > { %v1283_v31 = vsub.f32 %v1278_v27, %v1282_v30 }
 0x996   : > { %v1284_v32 = vmul.f32 %v1283_v31, %v1283_v31 }
 0x998   : > { %v1285_v33 = vsel %vm515_vm1, %v1284_v32, 0.0 }
 0x999   : > { %1286 = vadd.xlane.f32.xlu0 %v1285_v33 }
 0x99a   : > { %1754 = shalt.err (!%p1751_p7)
}
 0x99b   : > { %s1755_s25 = scalar_lea.hbm %s2183_s15, 512  ;;  %s1759_s24 = scalar_lea.hbm %s2283_s14, 1024 }
 0x99c   : > { %p1756_p8 = scmp.ne.s32.totalorder %s2183_s15, %s1755_s25  ;;  %p1760_p1 = scmp.lt.u32.totalorder %s2183_s15, %s2283_s14 }
 0x99d   : > { %p1761_p0 = scmp.lt.u32.totalorder %s1759_s24, %s1755_s25  ;;  %p1763_p6 = scmp.lt.u32.totalorder %s1755_s25, %s2183_s15 }
 0x99e   : > { %p1757_p11 = pnand %p1756_p8, %p2310_p9 }
 0x99f   : > { %p1762_p5 = por %p1761_p0, %p1760_p1 }
 0x9a0   : > { %p1758_p13 = pneg %p1757_p11 }
 0x9a1   : > { %p1764_p10 = por %p1763_p6, %p1762_p5 }
 0x9a3   : > { %p1765_p12 = pnand %p1764_p10, %p1758_p13 }
 0x9a5   : > { %1768 = shalt.err (!%p1765_p12)
}
 0x9a6   : > { %s1861_s0 = smov 128   ;;  %s1862_s20 = smov 256   ;;  %v1486_v38 = vld [vmem:[%s2280_s11] ss:$0 sm:$0xff] }
 0x9a7   : > { %s2311_s21 = smov 8   ;;  %s1452_s28 = sshll.u32 %s2094_s19, 3  ;;  %v1487_v40 = vld [vmem:[%s2281_s12] ss:$0 sm:$0xff] }
 0x9a8   : > { %1613 = dma.vmem_to_hbm [thread:$0]  (%p2310_p9), %s2186_s22, 512, %s2183_s15, %s1315_s18, %s1861_s0, %s1862_s20, %s2311_s21  }
 0x9a9   : > { %s477_s1 = scalar_lea.vmem [#allocation6], %s1452_s28  ;;  %s2312_s15 = sshll.u32 %s1960_s17, 7 }
 0x9aa   : > { %s1328_s2 = sshll.u32 %s477_s1, 4  ;;  %s2225_s0 = scalar_lea.hbm %s2282_s13, %s2312_s15  ;;  %s2227_s2 = int_to_ptr.vmem [resolvable:$true] %s1328_s2 }
 0x9ab   : > { %s1310_s20 = scalar_lea.sflag [#allocation5], %s2094_s19  ;;  %s1769_s21 = scalar_lea.vmem %s2227_s2, 128 }
 0x9ac   : > { %p1770_p2 = scmp.ne.s32.totalorder %s2227_s2, %s1769_s21  ;;  %s1863_s28 = smov [#allocation6]  }
 0x9ad   : > { %s1773_s17 = sshll.u32 %s1863_s28, 4  ;;  %s1774_s17 = int_to_ptr.vmem [resolvable:$false] %s1773_s17 }
 0x9ae   : > { %p1771_p3 = pnand %p1770_p2, %p2310_p9  ;;  %s1775_s25 = scalar_lea.vmem %s1774_s17, 256 }
 0x9af   : > { %p1776_p7 = scmp.lt.s32.totalorder %s2227_s2, %s1774_s17  ;;  %p1777_p8 = scmp.lt.s32.totalorder %s1775_s25, %s1769_s21 }
 0x9b0   : > { %p1772_p4 = pneg %p1771_p3 }
 0x9b1   : > { %p1778_p11 = por %p1777_p8, %p1776_p7 }
 0x9b3   : > { %p1779_p13 = pnand %p1778_p11, %p1772_p4 }
 0xa26   : > { %v1287_v34 = vpop.xlane.xlu0 %1286 }
 0xa27   : > { %v1288_v35 = vmul.f32 0.03125, %v1287_v34 }
 0xa29   : > { %v1289_v36 = vadd.f32 1e-05, %v1288_v35 }
 0xa2b   : > { %1711 = vrsqrt.f32 %v1289_v36 }
 0xa35   : > { %v1712_v37 = vpop.eup %1711 }
 0xa36   : > { %v1291_v39 = vmul.f32 %v1712_v37, %v1283_v31 }
 0xa38   : > { %v1299_v41 = vmul.f32 %v1486_v38, %v1291_v39 }
 0xa3a   : > { %v1307_v42 = vadd.f32 %v1487_v40, %v1299_v41 }
 0xa3c   : > { %1308 = vst.msk [vmem:[%s477_s1] sm:$0xff] %vm515_vm1, %v1307_v42 }
 0xa3d   : > { %1782 = shalt.err (!%p1779_p13)
}
 0xa3e   : > { %s1783_s1 = scalar_lea.hbm %s2225_s0, 128  ;;  %s1787_s24 = scalar_lea.hbm %s2282_s13, 256 }
 0xa3f   : > { %p1784_p1 = scmp.ne.s32.totalorder %s2225_s0, %s1783_s1  ;;  %p1788_p6 = scmp.lt.u32.totalorder %s2225_s0, %s2282_s13 }
 0xa40   : > { %p1789_p10 = scmp.lt.u32.totalorder %s1787_s24, %s1783_s1  ;;  %p1791_p2 = scmp.lt.u32.totalorder %s1783_s1, %s2225_s0 }
 0xa41   : > { %p1785_p0 = pnand %p1784_p1, %p2310_p9 }
 0xa42   : > { %p1790_p12 = por %p1789_p10, %p1788_p6 }
 0xa43   : > { %p1786_p5 = pneg %p1785_p0 }
 0xa44   : > { %p1792_p3 = por %p1791_p2, %p1790_p12 }
 0xa46   : > { %p1793_p4 = pnand %p1792_p3, %p1786_p5 }
 0xa48   : > { %1796 = shalt.err (!%p1793_p4)
}
 0xa49   : > { %1612 = dma.vmem_to_hbm [thread:$0]  (%p2310_p9), %s2227_s2, 128, %s2225_s0, %s1310_s20  }
 0xa4a PF: > { %s2313_s22 = sld [smem:[#allocation15_spill]]  ;;  %p1629_p7 = scmp.ge.s32.totalorder %s1839_s16, 2 }
 0xa4b   : > { %s1355_s18 = sand.u32 1, %s1827_s29  }
 0xa4c   : > { %s1356_s21 = scalar_lea.sflag [#allocation5], %s1355_s18 }
 0xa50   : > { %p2314_p8 = scmp.ne.s32.totalorder %s2313_s22, 0 }
 0xa52   : > { %p1621_p11 = pnand %p1629_p7, %p2314_p8 }
 0xa54   : > { %1818 = dma.done.wait (!%p1621_p11), %s1356_s21, 128  }
 0xa55   : > { %1820 = vsyncadd (!%p1621_p11), %s1356_s21, 4294967168  ;;  %s1365_s28 = scalar_lea.sflag [#allocation8], %s1355_s18 }
 0xa56   : > { %1822 = dma.done.wait (!%p1621_p11), %s1365_s28, 512  }
 0xa57   : > { %1824 = vsyncadd (!%p1621_p11), %s1365_s28, 4294966784  ;;  %s2315_s16 = sld [smem:[#allocation13_spill]]  ;;  %s2316_s23 = sld [smem:[#allocation12_spill]] }
 0xa58   : > { %s2317_s15 = sld [smem:[#allocation14_spill]]  ;;  %s2318_s29 = smov %s1831_s30 }
 0xa5d   : > { %p29_p9 = scmp.ge.s32.totalorder %s2315_s16, 4   ;;  %s2319_s30 = smov %s2316_s23 }
 0xa5f   :  { %31 = sbr.rel (!%p29_p9) target bundleno = 10 (0xa), region = 132 }
 0xa66   :  { %1370 = vsyncpa [#allocation4], 1 }
 0xa67   :  { %1372 = vsyncpa [#allocation4 + $0x1], 1 }
 0xa68   :  { %1373 = vsyncpa [#allocation5], 1 }
 0xa69   :  { %1375 = vsyncpa [#allocation5 + $0x1], 1 }
 0xa6a   :  { %1376 = vsyncpa [#allocation8], 1 }
 0xa6b   :  { %1378 = vsyncpa [#allocation8 + $0x1], 1 }

</bundles_post_ra>
